<compile_context>
chip_gen: v5e
topology: v5e:2x2
jax: 0.10.0
libtpu: 0.0.40
codegen_flags: <defaults>
</compile_context>

<pallas_src>
import jax
import jax.numpy as jnp
from jax.experimental import pallas as pl
from jax.experimental.pallas import tpu as pltpu


def _round_up(x, m):
    return (x + m - 1) // m * m


def _cdiv(a, b):
    return -(-a // b)


# Per-step W2 DMA/tile byte budget.  With Buffered(3) this keeps the dominant
# VMEM consumer at <= 12 MiB, which fits v5e/v6e (128 MiB) and v7x (64 MiB).
_MAX_W2_TILE_BYTES = 4 * 1024 * 1024
_MAX_BATCH = 64          # cap on hypernets per grid step (bounds kernel unroll)


def _choose_group_tiling(nh_g, out_total, hid, itemsize):
    """Pick (batch b, lane tile tn, n_tiles, padded out, padded nh) for a group."""
    out_pad = _round_up(out_total, 128)
    row_bytes = hid * out_pad * itemsize          # one hypernet's W2 (padded)
    if row_bytes <= _MAX_W2_TILE_BYTES:
        # Small out_total: one lane tile, batch hypernets per step instead.
        tn = out_pad
        n_tiles = 1
        b = max(1, min(nh_g, _MAX_W2_TILE_BYTES // max(row_bytes, 1), _MAX_BATCH))
    else:
        # Large out_total: one hypernet per step, tile the out axis.
        b = 1
        n_tiles = _cdiv(row_bytes, _MAX_W2_TILE_BYTES)
        tn = _round_up(_cdiv(out_pad, n_tiles), 128)
        n_tiles = _cdiv(out_pad, tn)
        out_pad = tn * n_tiles
    nh_pad = _round_up(nh_g, b)
    return b, tn, n_tiles, out_pad, nh_pad


def _make_group_kernel(b):
    """Kernel processing `b` hypernets per grid step (static unroll).

    x_ref : (b, 1, feat_pad)   net_in rows (zero padded past feat_dim)
    w1_ref: (b, feat_pad, hid) layer-1 weights, (in, out) layout
    w2_ref: (b, hid, tn)       layer-2 weight lane-tile, (in, out) layout
    o_ref : (b, 1, tn)         f32 output tile
    """
    def kernel(x_ref, w1_ref, w2_ref, o_ref):
        for i in range(b):                               # static unroll
            xi = x_ref[i]                                # (1, feat_pad)
            h = jnp.dot(xi, w1_ref[i], preferred_element_type=jnp.float32)
            h = jnp.maximum(h, 0.0)                      # ReLU in f32
            y = jnp.dot(h.astype(w2_ref.dtype), w2_ref[i],
                        preferred_element_type=jnp.float32)   # (1, tn)
            o_ref[i] = y.astype(o_ref.dtype)
    return kernel


def _group_pallas(x_all, w1_all, w2_all, gcfg, hid, feat_pad):
    b = gcfg["b"]
    tn = gcfg["tn"]
    n_tiles = gcfg["n_tiles"]
    nh_pad = gcfg["nh_pad"]
    out_pad = gcfg["out_pad"]
    grid_g = nh_pad // b

    w2_kwargs = {}
    if grid_g * n_tiles >= 3:
        # Triple-buffer the dominant (W2) stream only when the grid is long
        # enough for it to matter.
        w2_kwargs = dict(pipeline_mode=pl.Buffered(3))

    return pl.pallas_call(
        _make_group_kernel(b),
        out_shape=jax.ShapeDtypeStruct((nh_pad, 1, out_pad), jnp.float32),
        grid_spec=pltpu.PrefetchScalarGridSpec(
            num_scalar_prefetch=0,
            grid=(grid_g, n_tiles),
            in_specs=[
                pl.BlockSpec((b, 1, feat_pad), lambda g, j: (g, 0, 0)),
                pl.BlockSpec((b, feat_pad, hid), lambda g, j: (g, 0, 0)),
                pl.BlockSpec((b, hid, tn), lambda g, j: (g, 0, j), **w2_kwargs),
            ],
            out_specs=pl.BlockSpec((b, 1, tn), lambda g, j: (g, 0, j)),
        ),
        compiler_params=pltpu.CompilerParams(
            dimension_semantics=("parallel", "parallel"),
            vmem_limit_bytes=gcfg["vmem_limit"],
        ),
    )(x_all, w1_all, w2_all)


def init_parameter_translator(key, module_list, layer_ids, input_dim, output_dim,
                              lora_rank, hidden_dim=32,
                              param_dtype=jnp.bfloat16, init_std=1e-7):
    """Build all hypernet parameters pre-transposed to (in, out), grouped by
    out_total, stacked and zero-padded ONCE at init so the forward path does no
    weight relayout and never streams padded-to-out_max columns."""
    feat_dim = input_dim + 1
    feat_pad = _round_up(feat_dim, 128)      # lane-align the contraction dim
    itemsize = jnp.dtype(param_dtype).itemsize

    # Enumerate every hypernet with its static metadata.
    entries = []
    for module_name in module_list:
        for layer in layer_ids:
            for ab in ("A", "B"):
                if module_name == "down_proj":
                    rshape = (lora_rank, output_dim) if ab == "A" else (input_dim, lora_rank)
                else:
                    rshape = (lora_rank, input_dim) if ab == "A" else (output_dim, lora_rank)
                out_total = rshape[0] * rshape[1]
                name = (f"base_model.model.model.layers.{layer}.mlp."
                        f"{module_name}.lora_{ab}.weight")
                entries.append(dict(name=name, layer=layer,
                                    out_total=out_total, rshape=rshape))

    # Group by out_total so no hypernet streams zero-padded W2 columns.
    by_out = {}
    for idx, e in enumerate(entries):
        by_out.setdefault(e["out_total"], []).append(idx)

    group_params = []
    group_cfgs = []
    for out_total, idxs in sorted(by_out.items()):
        nh_g = len(idxs)
        b, tn, n_tiles, out_pad, nh_pad = _choose_group_tiling(
            nh_g, out_total, hidden_dim, itemsize)

        w1_rows, w2_rows, layer_vals, names, rshapes = [], [], [], [], []
        for gi in idxs:
            e = entries[gi]
            key, k1, k2 = jax.random.split(key, 3)
            # (in, out) layout == PyTorch nn.Linear (out, in) weight transposed.
            w1 = init_std * jax.random.normal(k1, (feat_dim, hidden_dim), jnp.float32)
            w2 = init_std * jax.random.normal(k2, (hidden_dim, out_total), jnp.float32)
            w1_rows.append(jnp.pad(w1, ((0, feat_pad - feat_dim), (0, 0))))
            w2_rows.append(jnp.pad(w2, ((0, 0), (0, out_pad - out_total))))
            layer_vals.append(float(e["layer"]))
            names.append(e["name"])
            rshapes.append(e["rshape"])

        # Pad the hypernet axis to a multiple of the per-step batch b.
        n_extra = nh_pad - nh_g
        w1_all = jnp.stack(
            w1_rows + [jnp.zeros_like(w1_rows[0])] * n_extra).astype(param_dtype)
        w2_all = jnp.stack(
            w2_rows + [jnp.zeros_like(w2_rows[0])] * n_extra).astype(param_dtype)
        layer_vec = jnp.array(layer_vals + [0.0] * n_extra, jnp.float32)

        # VMEM budget computed from actual block sizes (W2 x3 buffers, rest x2).
        w2_block = b * hidden_dim * tn * itemsize
        w1_block = b * feat_pad * hidden_dim * itemsize
        x_block = b * feat_pad * itemsize
        out_block = b * tn * 4
        need = 3 * w2_block + 2 * (w1_block + x_block + out_block) + (1 << 20)
        vmem_limit = int(min(48 * 1024 * 1024, max(16 * 1024 * 1024, 2 * need)))

        group_params.append(dict(w1=w1_all, w2=w2_all, layer=layer_vec))
        group_cfgs.append(dict(names=tuple(names), rshapes=tuple(rshapes),
                               out_total=out_total, out_pad=out_pad,
                               tn=tn, n_tiles=n_tiles, b=b,
                               nh=nh_g, nh_pad=nh_pad, vmem_limit=vmem_limit))

    params = dict(groups=tuple(group_params))
    cfg = dict(groups=tuple(group_cfgs), input_dim=input_dim, feat_dim=feat_dim,
               feat_pad=feat_pad, hid=hidden_dim)
    return params, cfg


def make_parameter_translator_forward(cfg):
    """Return a single jitted forward: x (1, input_dim) -> dict of LoRA tensors.
    All per-hypernet slicing/reshaping is folded into the same jit."""
    input_dim = cfg["input_dim"]
    feat_pad = cfg["feat_pad"]
    hid = cfg["hid"]
    group_cfgs = cfg["groups"]

    @jax.jit
    def forward(x, params):
        ret = {}
        for gcfg, gparams in zip(group_cfgs, params["groups"]):
            nh_pad = gcfg["nh_pad"]
            wdtype = gparams["w1"].dtype
            # Per-hypernet net_in = [x | layer_idx | 0-pad] -> (nh_pad, 1, feat_pad).
            x_rep = jnp.broadcast_to(
                x.reshape(1, 1, input_dim).astype(jnp.float32),
                (nh_pad, 1, input_dim))
            layer_col = gparams["layer"].reshape(nh_pad, 1, 1)
            pad = jnp.zeros((nh_pad, 1, feat_pad - input_dim - 1), jnp.float32)
            x_all = jnp.concatenate([x_rep, layer_col, pad], axis=-1).astype(wdtype)

            out = _group_pallas(x_all, gparams["w1"], gparams["w2"],
                                gcfg, hid, feat_pad)

            for gi in range(gcfg["nh"]):
                r, c = gcfg["rshapes"][gi]
                ret[gcfg["names"][gi]] = out[gi, 0, : r * c].reshape(r, c)
        return ret

    return forward


def reference_forward(x, params, cfg):
    """Pure-JAX reference matching the PyTorch module (f32 intermediates)."""
    feat_dim = cfg["feat_dim"]
    ret = {}
    for gcfg, gparams in zip(cfg["groups"], params["groups"]):
        w1 = gparams["w1"].astype(jnp.float32)
        w2 = gparams["w2"].astype(jnp.float32)
        layer = gparams["layer"]
        for gi in range(gcfg["nh"]):
            net_in = jnp.concatenate([x, layer[gi].reshape(1, 1)], axis=1)  # (1, feat_dim)
            h = jnp.maximum(net_in @ w1[gi, :feat_dim, :], 0.0)
            y = h @ w2[gi, :, : gcfg["out_total"]]
            ret[gcfg["names"][gi]] = y.reshape(gcfg["rshapes"][gi])
    return ret


if __name__ == "__main__":
    # Small shapes consistent with the module.
    module_list = ["gate_proj", "up_proj", "down_proj"]
    layer_ids = [0, 1]
    input_dim, output_dim, lora_rank, hidden_dim = 64, 96, 4, 32

    key = jax.random.PRNGKey(0)
    k_params, k_x = jax.random.split(key)
    x = jax.random.normal(k_x, (1, input_dim), jnp.float32)

    # ---- exact-match path (float32 weights, bigger init std so the check is meaningful)
    params32, cfg32 = init_parameter_translator(
        k_params, module_list, layer_ids, input_dim, output_dim, lora_rank,
        hidden_dim, param_dtype=jnp.float32, init_std=0.05)
    fwd32 = make_parameter_translator_forward(cfg32)
    out32 = jax.block_until_ready(fwd32(x, params32))
    ref32 = reference_forward(x, params32, cfg32)
    for gcfg in cfg32["groups"]:
        for gi in range(gcfg["nh"]):
            name = gcfg["names"][gi]
            a, b = out32[name], ref32[name]
            assert a.shape == b.shape == gcfg["rshapes"][gi], name
            assert jnp.allclose(a, b, atol=1e-5, rtol=1e-5), name

    # ---- default bf16 path (halved W2 HBM traffic; f32 accumulation), loose check.
    params16, cfg16 = init_parameter_translator(
        k_params, module_list, layer_ids, input_dim, output_dim, lora_rank,
        hidden_dim, param_dtype=jnp.bfloat16, init_std=0.05)
    fwd16 = make_parameter_translator_forward(cfg16)
    out16 = jax.block_until_ready(fwd16(x, params16))
    ref16 = reference_forward(x, params16, cfg16)
    for gcfg in cfg16["groups"]:
        for gi in range(gcfg["nh"]):
            name = gcfg["names"][gi]
            a, b = out16[name], ref16[name]
            assert a.shape == b.shape == gcfg["rshapes"][gi], name
            assert jnp.allclose(a, b, atol=1e-2, rtol=1e-1), name

    print("KERNEL_OK")
</pallas_src>

<mosaic_0001>
module attributes {stable_mosaic.version = 11 : i64} {
  func.func @kernel(%arg0: i32, %arg1: i32, %arg2: memref<6x1x128xf32, #tpu.memory_space<vmem>>, %arg3: memref<6x128x32xf32, #tpu.memory_space<vmem>>, %arg4: memref<6x32x384xf32, #tpu.memory_space<vmem>>, %arg5: memref<6x1x384xf32, #tpu.memory_space<vmem>>) attributes {dimension_semantics = [#tpu.dimension_semantics<parallel>, #tpu.dimension_semantics<parallel>], iteration_bounds = array<i64: 1, 1>, scalar_prefetch = 0 : i64, scratch_operands = 0 : i64, tpu.core_type = #tpu.core_type<tc>, window_params = [{transform_indices = @transform_0, window_bounds = array<i64: 6, 1, 128>}, {transform_indices = @transform_1, window_bounds = array<i64: 6, 128, 32>}, {transform_indices = @transform_2, window_bounds = array<i64: 6, 32, 384>}, {transform_indices = @transform_3, window_bounds = array<i64: 6, 1, 384>}]} {
    %c0 = arith.constant 0 : index
    %c0_0 = arith.constant 0 : index
    %c0_1 = arith.constant 0 : index
    %0 = vector.load %arg2[%c0, %c0_0, %c0_1] : memref<6x1x128xf32, #tpu.memory_space<vmem>>, vector<1x1x128xf32>
    %1 = vector.shape_cast %0 : vector<1x1x128xf32> to vector<1x128xf32>
    %c0_2 = arith.constant 0 : index
    %c0_3 = arith.constant 0 : index
    %c0_4 = arith.constant 0 : index
    %2 = vector.load %arg3[%c0_2, %c0_3, %c0_4] : memref<6x128x32xf32, #tpu.memory_space<vmem>>, vector<1x128x32xf32>
    %3 = vector.shape_cast %2 : vector<1x128x32xf32> to vector<128x32xf32>
    %cst = arith.constant dense<0.000000e+00> : vector<1x32xf32>
    %4 = tpu.matmul %1, %3, %cst {dimension_numbers = #tpu.dot_dimension_numbers<[1], [0], [0], [1], [0, 0, 1, 1], [], []>} : vector<1x128xf32>, vector<128x32xf32>, vector<1x32xf32> -> vector<1x32xf32>
    %cst_5 = arith.constant 0.000000e+00 : f32
    %5 = vector.broadcast %cst_5 : f32 to vector<1x32xf32>
    %6 = arith.maximumf %4, %5 : vector<1x32xf32>
    %c0_6 = arith.constant 0 : index
    %c0_7 = arith.constant 0 : index
    %c0_8 = arith.constant 0 : index
    %7 = vector.load %arg4[%c0_6, %c0_7, %c0_8] : memref<6x32x384xf32, #tpu.memory_space<vmem>>, vector<1x32x384xf32>
    %8 = vector.shape_cast %7 : vector<1x32x384xf32> to vector<32x384xf32>
    %cst_9 = arith.constant dense<0.000000e+00> : vector<1x384xf32>
    %9 = tpu.matmul %6, %8, %cst_9 {dimension_numbers = #tpu.dot_dimension_numbers<[1], [0], [0], [1], [0, 0, 1, 1], [], []>} : vector<1x32xf32>, vector<32x384xf32>, vector<1x384xf32> -> vector<1x384xf32>
    %c0_10 = arith.constant 0 : index
    %c0_11 = arith.constant 0 : index
    %c0_12 = arith.constant 0 : index
    %10 = vector.load %arg5[%c0_10, %c0_11, %c0_12] : memref<6x1x384xf32, #tpu.memory_space<vmem>>, vector<1x1x384xf32>
    %11 = vector.shape_cast %10 : vector<1x1x384xf32> to vector<1x384xf32>
    %12 = vector.shape_cast %9 : vector<1x384xf32> to vector<1x1x384xf32>
    tpu.vector_store %arg5[%c0_10, %c0_11, %c0_12], %12 {strides = array<i32>} : memref<6x1x384xf32, #tpu.memory_space<vmem>>, vector<1x1x384xf32>,
    %c1 = arith.constant 1 : index
    %c0_13 = arith.constant 0 : index
    %c0_14 = arith.constant 0 : index
    %13 = vector.load %arg2[%c1, %c0_13, %c0_14] : memref<6x1x128xf32, #tpu.memory_space<vmem>>, vector<1x1x128xf32>
    %14 = vector.shape_cast %13 : vector<1x1x128xf32> to vector<1x128xf32>
    %c1_15 = arith.constant 1 : index
    %c0_16 = arith.constant 0 : index
    %c0_17 = arith.constant 0 : index
    %15 = vector.load %arg3[%c1_15, %c0_16, %c0_17] : memref<6x128x32xf32, #tpu.memory_space<vmem>>, vector<1x128x32xf32>
    %16 = vector.shape_cast %15 : vector<1x128x32xf32> to vector<128x32xf32>
    %cst_18 = arith.constant dense<0.000000e+00> : vector<1x32xf32>
    %17 = tpu.matmul %14, %16, %cst_18 {dimension_numbers = #tpu.dot_dimension_numbers<[1], [0], [0], [1], [0, 0, 1, 1], [], []>} : vector<1x128xf32>, vector<128x32xf32>, vector<1x32xf32> -> vector<1x32xf32>
    %cst_19 = arith.constant 0.000000e+00 : f32
    %18 = vector.broadcast %cst_19 : f32 to vector<1x32xf32>
    %19 = arith.maximumf %17, %18 : vector<1x32xf32>
    %c1_20 = arith.constant 1 : index
    %c0_21 = arith.constant 0 : index
    %c0_22 = arith.constant 0 : index
    %20 = vector.load %arg4[%c1_20, %c0_21, %c0_22] : memref<6x32x384xf32, #tpu.memory_space<vmem>>, vector<1x32x384xf32>
    %21 = vector.shape_cast %20 : vector<1x32x384xf32> to vector<32x384xf32>
    %cst_23 = arith.constant dense<0.000000e+00> : vector<1x384xf32>
    %22 = tpu.matmul %19, %21, %cst_23 {dimension_numbers = #tpu.dot_dimension_numbers<[1], [0], [0], [1], [0, 0, 1, 1], [], []>} : vector<1x32xf32>, vector<32x384xf32>, vector<1x384xf32> -> vector<1x384xf32>
    %c1_24 = arith.constant 1 : index
    %c0_25 = arith.constant 0 : index
    %c0_26 = arith.constant 0 : index
    %23 = vector.load %arg5[%c1_24, %c0_25, %c0_26] : memref<6x1x384xf32, #tpu.memory_space<vmem>>, vector<1x1x384xf32>
    %24 = vector.shape_cast %23 : vector<1x1x384xf32> to vector<1x384xf32>
    %25 = vector.shape_cast %22 : vector<1x384xf32> to vector<1x1x384xf32>
    tpu.vector_store %arg5[%c1_24, %c0_25, %c0_26], %25 {strides = array<i32>} : memref<6x1x384xf32, #tpu.memory_space<vmem>>, vector<1x1x384xf32>,
    %c2 = arith.constant 2 : index
    %c0_27 = arith.constant 0 : index
    %c0_28 = arith.constant 0 : index
    %26 = vector.load %arg2[%c2, %c0_27, %c0_28] : memref<6x1x128xf32, #tpu.memory_space<vmem>>, vector<1x1x128xf32>
    %27 = vector.shape_cast %26 : vector<1x1x128xf32> to vector<1x128xf32>
    %c2_29 = arith.constant 2 : index
    %c0_30 = arith.constant 0 : index
    %c0_31 = arith.constant 0 : index
    %28 = vector.load %arg3[%c2_29, %c0_30, %c0_31] : memref<6x128x32xf32, #tpu.memory_space<vmem>>, vector<1x128x32xf32>
    %29 = vector.shape_cast %28 : vector<1x128x32xf32> to vector<128x32xf32>
    %cst_32 = arith.constant dense<0.000000e+00> : vector<1x32xf32>
    %30 = tpu.matmul %27, %29, %cst_32 {dimension_numbers = #tpu.dot_dimension_numbers<[1], [0], [0], [1], [0, 0, 1, 1], [], []>} : vector<1x128xf32>, vector<128x32xf32>, vector<1x32xf32> -> vector<1x32xf32>
    %cst_33 = arith.constant 0.000000e+00 : f32
    %31 = vector.broadcast %cst_33 : f32 to vector<1x32xf32>
    %32 = arith.maximumf %30, %31 : vector<1x32xf32>
    %c2_34 = arith.constant 2 : index
    %c0_35 = arith.constant 0 : index
    %c0_36 = arith.constant 0 : index
    %33 = vector.load %arg4[%c2_34, %c0_35, %c0_36] : memref<6x32x384xf32, #tpu.memory_space<vmem>>, vector<1x32x384xf32>
    %34 = vector.shape_cast %33 : vector<1x32x384xf32> to vector<32x384xf32>
    %cst_37 = arith.constant dense<0.000000e+00> : vector<1x384xf32>
    %35 = tpu.matmul %32, %34, %cst_37 {dimension_numbers = #tpu.dot_dimension_numbers<[1], [0], [0], [1], [0, 0, 1, 1], [], []>} : vector<1x32xf32>, vector<32x384xf32>, vector<1x384xf32> -> vector<1x384xf32>
    %c2_38 = arith.constant 2 : index
    %c0_39 = arith.constant 0 : index
    %c0_40 = arith.constant 0 : index
    %36 = vector.load %arg5[%c2_38, %c0_39, %c0_40] : memref<6x1x384xf32, #tpu.memory_space<vmem>>, vector<1x1x384xf32>
    %37 = vector.shape_cast %36 : vector<1x1x384xf32> to vector<1x384xf32>
    %38 = vector.shape_cast %35 : vector<1x384xf32> to vector<1x1x384xf32>
    tpu.vector_store %arg5[%c2_38, %c0_39, %c0_40], %38 {strides = array<i32>} : memref<6x1x384xf32, #tpu.memory_space<vmem>>, vector<1x1x384xf32>,
    %c3 = arith.constant 3 : index
    %c0_41 = arith.constant 0 : index
    %c0_42 = arith.constant 0 : index
    %39 = vector.load %arg2[%c3, %c0_41, %c0_42] : memref<6x1x128xf32, #tpu.memory_space<vmem>>, vector<1x1x128xf32>
    %40 = vector.shape_cast %39 : vector<1x1x128xf32> to vector<1x128xf32>
    %c3_43 = arith.constant 3 : index
    %c0_44 = arith.constant 0 : index
    %c0_45 = arith.constant 0 : index
    %41 = vector.load %arg3[%c3_43, %c0_44, %c0_45] : memref<6x128x32xf32, #tpu.memory_space<vmem>>, vector<1x128x32xf32>
    %42 = vector.shape_cast %41 : vector<1x128x32xf32> to vector<128x32xf32>
    %cst_46 = arith.constant dense<0.000000e+00> : vector<1x32xf32>
    %43 = tpu.matmul %40, %42, %cst_46 {dimension_numbers = #tpu.dot_dimension_numbers<[1], [0], [0], [1], [0, 0, 1, 1], [], []>} : vector<1x128xf32>, vector<128x32xf32>, vector<1x32xf32> -> vector<1x32xf32>
    %cst_47 = arith.constant 0.000000e+00 : f32
    %44 = vector.broadcast %cst_47 : f32 to vector<1x32xf32>
    %45 = arith.maximumf %43, %44 : vector<1x32xf32>
    %c3_48 = arith.constant 3 : index
    %c0_49 = arith.constant 0 : index
    %c0_50 = arith.constant 0 : index
    %46 = vector.load %arg4[%c3_48, %c0_49, %c0_50] : memref<6x32x384xf32, #tpu.memory_space<vmem>>, vector<1x32x384xf32>
    %47 = vector.shape_cast %46 : vector<1x32x384xf32> to vector<32x384xf32>
    %cst_51 = arith.constant dense<0.000000e+00> : vector<1x384xf32>
    %48 = tpu.matmul %45, %47, %cst_51 {dimension_numbers = #tpu.dot_dimension_numbers<[1], [0], [0], [1], [0, 0, 1, 1], [], []>} : vector<1x32xf32>, vector<32x384xf32>, vector<1x384xf32> -> vector<1x384xf32>
    %c3_52 = arith.constant 3 : index
    %c0_53 = arith.constant 0 : index
    %c0_54 = arith.constant 0 : index
    %49 = vector.load %arg5[%c3_52, %c0_53, %c0_54] : memref<6x1x384xf32, #tpu.memory_space<vmem>>, vector<1x1x384xf32>
    %50 = vector.shape_cast %49 : vector<1x1x384xf32> to vector<1x384xf32>
    %51 = vector.shape_cast %48 : vector<1x384xf32> to vector<1x1x384xf32>
    tpu.vector_store %arg5[%c3_52, %c0_53, %c0_54], %51 {strides = array<i32>} : memref<6x1x384xf32, #tpu.memory_space<vmem>>, vector<1x1x384xf32>,
    %c4 = arith.constant 4 : index
    %c0_55 = arith.constant 0 : index
    %c0_56 = arith.constant 0 : index
    %52 = vector.load %arg2[%c4, %c0_55, %c0_56] : memref<6x1x128xf32, #tpu.memory_space<vmem>>, vector<1x1x128xf32>
    %53 = vector.shape_cast %52 : vector<1x1x128xf32> to vector<1x128xf32>
    %c4_57 = arith.constant 4 : index
    %c0_58 = arith.constant 0 : index
    %c0_59 = arith.constant 0 : index
    %54 = vector.load %arg3[%c4_57, %c0_58, %c0_59] : memref<6x128x32xf32, #tpu.memory_space<vmem>>, vector<1x128x32xf32>
    %55 = vector.shape_cast %54 : vector<1x128x32xf32> to vector<128x32xf32>
    %cst_60 = arith.constant dense<0.000000e+00> : vector<1x32xf32>
    %56 = tpu.matmul %53, %55, %cst_60 {dimension_numbers = #tpu.dot_dimension_numbers<[1], [0], [0], [1], [0, 0, 1, 1], [], []>} : vector<1x128xf32>, vector<128x32xf32>, vector<1x32xf32> -> vector<1x32xf32>
    %cst_61 = arith.constant 0.000000e+00 : f32
    %57 = vector.broadcast %cst_61 : f32 to vector<1x32xf32>
    %58 = arith.maximumf %56, %57 : vector<1x32xf32>
    %c4_62 = arith.constant 4 : index
    %c0_63 = arith.constant 0 : index
    %c0_64 = arith.constant 0 : index
    %59 = vector.load %arg4[%c4_62, %c0_63, %c0_64] : memref<6x32x384xf32, #tpu.memory_space<vmem>>, vector<1x32x384xf32>
    %60 = vector.shape_cast %59 : vector<1x32x384xf32> to vector<32x384xf32>
    %cst_65 = arith.constant dense<0.000000e+00> : vector<1x384xf32>
    %61 = tpu.matmul %58, %60, %cst_65 {dimension_numbers = #tpu.dot_dimension_numbers<[1], [0], [0], [1], [0, 0, 1, 1], [], []>} : vector<1x32xf32>, vector<32x384xf32>, vector<1x384xf32> -> vector<1x384xf32>
    %c4_66 = arith.constant 4 : index
    %c0_67 = arith.constant 0 : index
    %c0_68 = arith.constant 0 : index
    %62 = vector.load %arg5[%c4_66, %c0_67, %c0_68] : memref<6x1x384xf32, #tpu.memory_space<vmem>>, vector<1x1x384xf32>
    %63 = vector.shape_cast %62 : vector<1x1x384xf32> to vector<1x384xf32>
    %64 = vector.shape_cast %61 : vector<1x384xf32> to vector<1x1x384xf32>
    tpu.vector_store %arg5[%c4_66, %c0_67, %c0_68], %64 {strides = array<i32>} : memref<6x1x384xf32, #tpu.memory_space<vmem>>, vector<1x1x384xf32>,
    %c5 = arith.constant 5 : index
    %c0_69 = arith.constant 0 : index
    %c0_70 = arith.constant 0 : index
    %65 = vector.load %arg2[%c5, %c0_69, %c0_70] : memref<6x1x128xf32, #tpu.memory_space<vmem>>, vector<1x1x128xf32>
    %66 = vector.shape_cast %65 : vector<1x1x128xf32> to vector<1x128xf32>
    %c5_71 = arith.constant 5 : index
    %c0_72 = arith.constant 0 : index
    %c0_73 = arith.constant 0 : index
    %67 = vector.load %arg3[%c5_71, %c0_72, %c0_73] : memref<6x128x32xf32, #tpu.memory_space<vmem>>, vector<1x128x32xf32>
    %68 = vector.shape_cast %67 : vector<1x128x32xf32> to vector<128x32xf32>
    %cst_74 = arith.constant dense<0.000000e+00> : vector<1x32xf32>
    %69 = tpu.matmul %66, %68, %cst_74 {dimension_numbers = #tpu.dot_dimension_numbers<[1], [0], [0], [1], [0, 0, 1, 1], [], []>} : vector<1x128xf32>, vector<128x32xf32>, vector<1x32xf32> -> vector<1x32xf32>
    %cst_75 = arith.constant 0.000000e+00 : f32
    %70 = vector.broadcast %cst_75 : f32 to vector<1x32xf32>
    %71 = arith.maximumf %69, %70 : vector<1x32xf32>
    %c5_76 = arith.constant 5 : index
    %c0_77 = arith.constant 0 : index
    %c0_78 = arith.constant 0 : index
    %72 = vector.load %arg4[%c5_76, %c0_77, %c0_78] : memref<6x32x384xf32, #tpu.memory_space<vmem>>, vector<1x32x384xf32>
    %73 = vector.shape_cast %72 : vector<1x32x384xf32> to vector<32x384xf32>
    %cst_79 = arith.constant dense<0.000000e+00> : vector<1x384xf32>
    %74 = tpu.matmul %71, %73, %cst_79 {dimension_numbers = #tpu.dot_dimension_numbers<[1], [0], [0], [1], [0, 0, 1, 1], [], []>} : vector<1x32xf32>, vector<32x384xf32>, vector<1x384xf32> -> vector<1x384xf32>
    %c5_80 = arith.constant 5 : index
    %c0_81 = arith.constant 0 : index
    %c0_82 = arith.constant 0 : index
    %75 = vector.load %arg5[%c5_80, %c0_81, %c0_82] : memref<6x1x384xf32, #tpu.memory_space<vmem>>, vector<1x1x384xf32>
    %76 = vector.shape_cast %75 : vector<1x1x384xf32> to vector<1x384xf32>
    %77 = vector.shape_cast %74 : vector<1x384xf32> to vector<1x1x384xf32>
    tpu.vector_store %arg5[%c5_80, %c0_81, %c0_82], %77 {strides = array<i32>} : memref<6x1x384xf32, #tpu.memory_space<vmem>>, vector<1x1x384xf32>,
    return
  }
  func.func @transform_0(%arg0: i32, %arg1: i32) -> (i32, i32, i32) {
    %c0_i32 = arith.constant 0 : i32
    %c0_i32_0 = arith.constant 0 : i32
    %c0_i32_1 = arith.constant 0 : i32
    return %arg0, %c0_i32, %c0_i32_0 : i32, i32, i32
  }
  func.func @transform_1(%arg0: i32, %arg1: i32) -> (i32, i32, i32) {
    %c0_i32 = arith.constant 0 : i32
    %c0_i32_0 = arith.constant 0 : i32
    %c0_i32_1 = arith.constant 0 : i32
    return %arg0, %c0_i32, %c0_i32_0 : i32, i32, i32
  }
  func.func @transform_2(%arg0: i32, %arg1: i32) -> (i32, i32, i32) {
    %c0_i32 = arith.constant 0 : i32
    %c0_i32_0 = arith.constant 0 : i32
    return %arg0, %c0_i32, %arg1 : i32, i32, i32
  }
  func.func @transform_3(%arg0: i32, %arg1: i32) -> (i32, i32, i32) {
    %c0_i32 = arith.constant 0 : i32
    %c0_i32_0 = arith.constant 0 : i32
    return %arg0, %c0_i32, %arg1 : i32, i32, i32
  }
}

module attributes {stable_mosaic.version = 11 : i64} {
  func.func @kernel(%arg0: i32, %arg1: i32, %arg2: memref<6x1x128xf32, #tpu.memory_space<vmem>>, %arg3: memref<6x128x32xf32, #tpu.memory_space<vmem>>, %arg4: memref<6x32x256xf32, #tpu.memory_space<vmem>>, %arg5: memref<6x1x256xf32, #tpu.memory_space<vmem>>) attributes {dimension_semantics = [#tpu.dimension_semantics<parallel>, #tpu.dimension_semantics<parallel>], iteration_bounds = array<i64: 1, 1>, scalar_prefetch = 0 : i64, scratch_operands = 0 : i64, tpu.core_type = #tpu.core_type<tc>, window_params = [{transform_indices = @transform_0, window_bounds = array<i64: 6, 1, 128>}, {transform_indices = @transform_1, window_bounds = array<i64: 6, 128, 32>}, {transform_indices = @transform_2, window_bounds = array<i64: 6, 32, 256>}, {transform_indices = @transform_3, window_bounds = array<i64: 6, 1, 256>}]} {
    %c0 = arith.constant 0 : index
    %c0_0 = arith.constant 0 : index
    %c0_1 = arith.constant 0 : index
    %0 = vector.load %arg2[%c0, %c0_0, %c0_1] : memref<6x1x128xf32, #tpu.memory_space<vmem>>, vector<1x1x128xf32>
    %1 = vector.shape_cast %0 : vector<1x1x128xf32> to vector<1x128xf32>
    %c0_2 = arith.constant 0 : index
    %c0_3 = arith.constant 0 : index
    %c0_4 = arith.constant 0 : index
    %2 = vector.load %arg3[%c0_2, %c0_3, %c0_4] : memref<6x128x32xf32, #tpu.memory_space<vmem>>, vector<1x128x32xf32>
    %3 = vector.shape_cast %2 : vector<1x128x32xf32> to vector<128x32xf32>
    %cst = arith.constant dense<0.000000e+00> : vector<1x32xf32>
    %4 = tpu.matmul %1, %3, %cst {dimension_numbers = #tpu.dot_dimension_numbers<[1], [0], [0], [1], [0, 0, 1, 1], [], []>} : vector<1x128xf32>, vector<128x32xf32>, vector<1x32xf32> -> vector<1x32xf32>
    %cst_5 = arith.constant 0.000000e+00 : f32
    %5 = vector.broadcast %cst_5 : f32 to vector<1x32xf32>
    %6 = arith.maximumf %4, %5 : vector<1x32xf32>
    %c0_6 = arith.constant 0 : index
    %c0_7 = arith.constant 0 : index
    %c0_8 = arith.constant 0 : index
    %7 = vector.load %arg4[%c0_6, %c0_7, %c0_8] : memref<6x32x256xf32, #tpu.memory_space<vmem>>, vector<1x32x256xf32>
    %8 = vector.shape_cast %7 : vector<1x32x256xf32> to vector<32x256xf32>
    %cst_9 = arith.constant dense<0.000000e+00> : vector<1x256xf32>
    %9 = tpu.matmul %6, %8, %cst_9 {dimension_numbers = #tpu.dot_dimension_numbers<[1], [0], [0], [1], [0, 0, 1, 1], [], []>} : vector<1x32xf32>, vector<32x256xf32>, vector<1x256xf32> -> vector<1x256xf32>
    %c0_10 = arith.constant 0 : index
    %c0_11 = arith.constant 0 : index
    %c0_12 = arith.constant 0 : index
    %10 = vector.load %arg5[%c0_10, %c0_11, %c0_12] : memref<6x1x256xf32, #tpu.memory_space<vmem>>, vector<1x1x256xf32>
    %11 = vector.shape_cast %10 : vector<1x1x256xf32> to vector<1x256xf32>
    %12 = vector.shape_cast %9 : vector<1x256xf32> to vector<1x1x256xf32>
    tpu.vector_store %arg5[%c0_10, %c0_11, %c0_12], %12 {strides = array<i32>} : memref<6x1x256xf32, #tpu.memory_space<vmem>>, vector<1x1x256xf32>,
    %c1 = arith.constant 1 : index
    %c0_13 = arith.constant 0 : index
    %c0_14 = arith.constant 0 : index
    %13 = vector.load %arg2[%c1, %c0_13, %c0_14] : memref<6x1x128xf32, #tpu.memory_space<vmem>>, vector<1x1x128xf32>
    %14 = vector.shape_cast %13 : vector<1x1x128xf32> to vector<1x128xf32>
    %c1_15 = arith.constant 1 : index
    %c0_16 = arith.constant 0 : index
    %c0_17 = arith.constant 0 : index
    %15 = vector.load %arg3[%c1_15, %c0_16, %c0_17] : memref<6x128x32xf32, #tpu.memory_space<vmem>>, vector<1x128x32xf32>
    %16 = vector.shape_cast %15 : vector<1x128x32xf32> to vector<128x32xf32>
    %cst_18 = arith.constant dense<0.000000e+00> : vector<1x32xf32>
    %17 = tpu.matmul %14, %16, %cst_18 {dimension_numbers = #tpu.dot_dimension_numbers<[1], [0], [0], [1], [0, 0, 1, 1], [], []>} : vector<1x128xf32>, vector<128x32xf32>, vector<1x32xf32> -> vector<1x32xf32>
    %cst_19 = arith.constant 0.000000e+00 : f32
    %18 = vector.broadcast %cst_19 : f32 to vector<1x32xf32>
    %19 = arith.maximumf %17, %18 : vector<1x32xf32>
    %c1_20 = arith.constant 1 : index
    %c0_21 = arith.constant 0 : index
    %c0_22 = arith.constant 0 : index
    %20 = vector.load %arg4[%c1_20, %c0_21, %c0_22] : memref<6x32x256xf32, #tpu.memory_space<vmem>>, vector<1x32x256xf32>
    %21 = vector.shape_cast %20 : vector<1x32x256xf32> to vector<32x256xf32>
    %cst_23 = arith.constant dense<0.000000e+00> : vector<1x256xf32>
    %22 = tpu.matmul %19, %21, %cst_23 {dimension_numbers = #tpu.dot_dimension_numbers<[1], [0], [0], [1], [0, 0, 1, 1], [], []>} : vector<1x32xf32>, vector<32x256xf32>, vector<1x256xf32> -> vector<1x256xf32>
    %c1_24 = arith.constant 1 : index
    %c0_25 = arith.constant 0 : index
    %c0_26 = arith.constant 0 : index
    %23 = vector.load %arg5[%c1_24, %c0_25, %c0_26] : memref<6x1x256xf32, #tpu.memory_space<vmem>>, vector<1x1x256xf32>
    %24 = vector.shape_cast %23 : vector<1x1x256xf32> to vector<1x256xf32>
    %25 = vector.shape_cast %22 : vector<1x256xf32> to vector<1x1x256xf32>
    tpu.vector_store %arg5[%c1_24, %c0_25, %c0_26], %25 {strides = array<i32>} : memref<6x1x256xf32, #tpu.memory_space<vmem>>, vector<1x1x256xf32>,
    %c2 = arith.constant 2 : index
    %c0_27 = arith.constant 0 : index
    %c0_28 = arith.constant 0 : index
    %26 = vector.load %arg2[%c2, %c0_27, %c0_28] : memref<6x1x128xf32, #tpu.memory_space<vmem>>, vector<1x1x128xf32>
    %27 = vector.shape_cast %26 : vector<1x1x128xf32> to vector<1x128xf32>
    %c2_29 = arith.constant 2 : index
    %c0_30 = arith.constant 0 : index
    %c0_31 = arith.constant 0 : index
    %28 = vector.load %arg3[%c2_29, %c0_30, %c0_31] : memref<6x128x32xf32, #tpu.memory_space<vmem>>, vector<1x128x32xf32>
    %29 = vector.shape_cast %28 : vector<1x128x32xf32> to vector<128x32xf32>
    %cst_32 = arith.constant dense<0.000000e+00> : vector<1x32xf32>
    %30 = tpu.matmul %27, %29, %cst_32 {dimension_numbers = #tpu.dot_dimension_numbers<[1], [0], [0], [1], [0, 0, 1, 1], [], []>} : vector<1x128xf32>, vector<128x32xf32>, vector<1x32xf32> -> vector<1x32xf32>
    %cst_33 = arith.constant 0.000000e+00 : f32
    %31 = vector.broadcast %cst_33 : f32 to vector<1x32xf32>
    %32 = arith.maximumf %30, %31 : vector<1x32xf32>
    %c2_34 = arith.constant 2 : index
    %c0_35 = arith.constant 0 : index
    %c0_36 = arith.constant 0 : index
    %33 = vector.load %arg4[%c2_34, %c0_35, %c0_36] : memref<6x32x256xf32, #tpu.memory_space<vmem>>, vector<1x32x256xf32>
    %34 = vector.shape_cast %33 : vector<1x32x256xf32> to vector<32x256xf32>
    %cst_37 = arith.constant dense<0.000000e+00> : vector<1x256xf32>
    %35 = tpu.matmul %32, %34, %cst_37 {dimension_numbers = #tpu.dot_dimension_numbers<[1], [0], [0], [1], [0, 0, 1, 1], [], []>} : vector<1x32xf32>, vector<32x256xf32>, vector<1x256xf32> -> vector<1x256xf32>
    %c2_38 = arith.constant 2 : index
    %c0_39 = arith.constant 0 : index
    %c0_40 = arith.constant 0 : index
    %36 = vector.load %arg5[%c2_38, %c0_39, %c0_40] : memref<6x1x256xf32, #tpu.memory_space<vmem>>, vector<1x1x256xf32>
    %37 = vector.shape_cast %36 : vector<1x1x256xf32> to vector<1x256xf32>
    %38 = vector.shape_cast %35 : vector<1x256xf32> to vector<1x1x256xf32>
    tpu.vector_store %arg5[%c2_38, %c0_39, %c0_40], %38 {strides = array<i32>} : memref<6x1x256xf32, #tpu.memory_space<vmem>>, vector<1x1x256xf32>,
    %c3 = arith.constant 3 : index
    %c0_41 = arith.constant 0 : index
    %c0_42 = arith.constant 0 : index
    %39 = vector.load %arg2[%c3, %c0_41, %c0_42] : memref<6x1x128xf32, #tpu.memory_space<vmem>>, vector<1x1x128xf32>
    %40 = vector.shape_cast %39 : vector<1x1x128xf32> to vector<1x128xf32>
    %c3_43 = arith.constant 3 : index
    %c0_44 = arith.constant 0 : index
    %c0_45 = arith.constant 0 : index
    %41 = vector.load %arg3[%c3_43, %c0_44, %c0_45] : memref<6x128x32xf32, #tpu.memory_space<vmem>>, vector<1x128x32xf32>
    %42 = vector.shape_cast %41 : vector<1x128x32xf32> to vector<128x32xf32>
    %cst_46 = arith.constant dense<0.000000e+00> : vector<1x32xf32>
    %43 = tpu.matmul %40, %42, %cst_46 {dimension_numbers = #tpu.dot_dimension_numbers<[1], [0], [0], [1], [0, 0, 1, 1], [], []>} : vector<1x128xf32>, vector<128x32xf32>, vector<1x32xf32> -> vector<1x32xf32>
    %cst_47 = arith.constant 0.000000e+00 : f32
    %44 = vector.broadcast %cst_47 : f32 to vector<1x32xf32>
    %45 = arith.maximumf %43, %44 : vector<1x32xf32>
    %c3_48 = arith.constant 3 : index
    %c0_49 = arith.constant 0 : index
    %c0_50 = arith.constant 0 : index
    %46 = vector.load %arg4[%c3_48, %c0_49, %c0_50] : memref<6x32x256xf32, #tpu.memory_space<vmem>>, vector<1x32x256xf32>
    %47 = vector.shape_cast %46 : vector<1x32x256xf32> to vector<32x256xf32>
    %cst_51 = arith.constant dense<0.000000e+00> : vector<1x256xf32>
    %48 = tpu.matmul %45, %47, %cst_51 {dimension_numbers = #tpu.dot_dimension_numbers<[1], [0], [0], [1], [0, 0, 1, 1], [], []>} : vector<1x32xf32>, vector<32x256xf32>, vector<1x256xf32> -> vector<1x256xf32>
    %c3_52 = arith.constant 3 : index
    %c0_53 = arith.constant 0 : index
    %c0_54 = arith.constant 0 : index
    %49 = vector.load %arg5[%c3_52, %c0_53, %c0_54] : memref<6x1x256xf32, #tpu.memory_space<vmem>>, vector<1x1x256xf32>
    %50 = vector.shape_cast %49 : vector<1x1x256xf32> to vector<1x256xf32>
    %51 = vector.shape_cast %48 : vector<1x256xf32> to vector<1x1x256xf32>
    tpu.vector_store %arg5[%c3_52, %c0_53, %c0_54], %51 {strides = array<i32>} : memref<6x1x256xf32, #tpu.memory_space<vmem>>, vector<1x1x256xf32>,
    %c4 = arith.constant 4 : index
    %c0_55 = arith.constant 0 : index
    %c0_56 = arith.constant 0 : index
    %52 = vector.load %arg2[%c4, %c0_55, %c0_56] : memref<6x1x128xf32, #tpu.memory_space<vmem>>, vector<1x1x128xf32>
    %53 = vector.shape_cast %52 : vector<1x1x128xf32> to vector<1x128xf32>
    %c4_57 = arith.constant 4 : index
    %c0_58 = arith.constant 0 : index
    %c0_59 = arith.constant 0 : index
    %54 = vector.load %arg3[%c4_57, %c0_58, %c0_59] : memref<6x128x32xf32, #tpu.memory_space<vmem>>, vector<1x128x32xf32>
    %55 = vector.shape_cast %54 : vector<1x128x32xf32> to vector<128x32xf32>
    %cst_60 = arith.constant dense<0.000000e+00> : vector<1x32xf32>
    %56 = tpu.matmul %53, %55, %cst_60 {dimension_numbers = #tpu.dot_dimension_numbers<[1], [0], [0], [1], [0, 0, 1, 1], [], []>} : vector<1x128xf32>, vector<128x32xf32>, vector<1x32xf32> -> vector<1x32xf32>
    %cst_61 = arith.constant 0.000000e+00 : f32
    %57 = vector.broadcast %cst_61 : f32 to vector<1x32xf32>
    %58 = arith.maximumf %56, %57 : vector<1x32xf32>
    %c4_62 = arith.constant 4 : index
    %c0_63 = arith.constant 0 : index
    %c0_64 = arith.constant 0 : index
    %59 = vector.load %arg4[%c4_62, %c0_63, %c0_64] : memref<6x32x256xf32, #tpu.memory_space<vmem>>, vector<1x32x256xf32>
    %60 = vector.shape_cast %59 : vector<1x32x256xf32> to vector<32x256xf32>
    %cst_65 = arith.constant dense<0.000000e+00> : vector<1x256xf32>
    %61 = tpu.matmul %58, %60, %cst_65 {dimension_numbers = #tpu.dot_dimension_numbers<[1], [0], [0], [1], [0, 0, 1, 1], [], []>} : vector<1x32xf32>, vector<32x256xf32>, vector<1x256xf32> -> vector<1x256xf32>
    %c4_66 = arith.constant 4 : index
    %c0_67 = arith.constant 0 : index
    %c0_68 = arith.constant 0 : index
    %62 = vector.load %arg5[%c4_66, %c0_67, %c0_68] : memref<6x1x256xf32, #tpu.memory_space<vmem>>, vector<1x1x256xf32>
    %63 = vector.shape_cast %62 : vector<1x1x256xf32> to vector<1x256xf32>
    %64 = vector.shape_cast %61 : vector<1x256xf32> to vector<1x1x256xf32>
    tpu.vector_store %arg5[%c4_66, %c0_67, %c0_68], %64 {strides = array<i32>} : memref<6x1x256xf32, #tpu.memory_space<vmem>>, vector<1x1x256xf32>,
    %c5 = arith.constant 5 : index
    %c0_69 = arith.constant 0 : index
    %c0_70 = arith.constant 0 : index
    %65 = vector.load %arg2[%c5, %c0_69, %c0_70] : memref<6x1x128xf32, #tpu.memory_space<vmem>>, vector<1x1x128xf32>
    %66 = vector.shape_cast %65 : vector<1x1x128xf32> to vector<1x128xf32>
    %c5_71 = arith.constant 5 : index
    %c0_72 = arith.constant 0 : index
    %c0_73 = arith.constant 0 : index
    %67 = vector.load %arg3[%c5_71, %c0_72, %c0_73] : memref<6x128x32xf32, #tpu.memory_space<vmem>>, vector<1x128x32xf32>
    %68 = vector.shape_cast %67 : vector<1x128x32xf32> to vector<128x32xf32>
    %cst_74 = arith.constant dense<0.000000e+00> : vector<1x32xf32>
    %69 = tpu.matmul %66, %68, %cst_74 {dimension_numbers = #tpu.dot_dimension_numbers<[1], [0], [0], [1], [0, 0, 1, 1], [], []>} : vector<1x128xf32>, vector<128x32xf32>, vector<1x32xf32> -> vector<1x32xf32>
    %cst_75 = arith.constant 0.000000e+00 : f32
    %70 = vector.broadcast %cst_75 : f32 to vector<1x32xf32>
    %71 = arith.maximumf %69, %70 : vector<1x32xf32>
    %c5_76 = arith.constant 5 : index
    %c0_77 = arith.constant 0 : index
    %c0_78 = arith.constant 0 : index
    %72 = vector.load %arg4[%c5_76, %c0_77, %c0_78] : memref<6x32x256xf32, #tpu.memory_space<vmem>>, vector<1x32x256xf32>
    %73 = vector.shape_cast %72 : vector<1x32x256xf32> to vector<32x256xf32>
    %cst_79 = arith.constant dense<0.000000e+00> : vector<1x256xf32>
    %74 = tpu.matmul %71, %73, %cst_79 {dimension_numbers = #tpu.dot_dimension_numbers<[1], [0], [0], [1], [0, 0, 1, 1], [], []>} : vector<1x32xf32>, vector<32x256xf32>, vector<1x256xf32> -> vector<1x256xf32>
    %c5_80 = arith.constant 5 : index
    %c0_81 = arith.constant 0 : index
    %c0_82 = arith.constant 0 : index
    %75 = vector.load %arg5[%c5_80, %c0_81, %c0_82] : memref<6x1x256xf32, #tpu.memory_space<vmem>>, vector<1x1x256xf32>
    %76 = vector.shape_cast %75 : vector<1x1x256xf32> to vector<1x256xf32>
    %77 = vector.shape_cast %74 : vector<1x256xf32> to vector<1x1x256xf32>
    tpu.vector_store %arg5[%c5_80, %c0_81, %c0_82], %77 {strides = array<i32>} : memref<6x1x256xf32, #tpu.memory_space<vmem>>, vector<1x1x256xf32>,
    return
  }
  func.func @transform_0(%arg0: i32, %arg1: i32) -> (i32, i32, i32) {
    %c0_i32 = arith.constant 0 : i32
    %c0_i32_0 = arith.constant 0 : i32
    %c0_i32_1 = arith.constant 0 : i32
    return %arg0, %c0_i32, %c0_i32_0 : i32, i32, i32
  }
  func.func @transform_1(%arg0: i32, %arg1: i32) -> (i32, i32, i32) {
    %c0_i32 = arith.constant 0 : i32
    %c0_i32_0 = arith.constant 0 : i32
    %c0_i32_1 = arith.constant 0 : i32
    return %arg0, %c0_i32, %c0_i32_0 : i32, i32, i32
  }
  func.func @transform_2(%arg0: i32, %arg1: i32) -> (i32, i32, i32) {
    %c0_i32 = arith.constant 0 : i32
    %c0_i32_0 = arith.constant 0 : i32
    return %arg0, %c0_i32, %arg1 : i32, i32, i32
  }
  func.func @transform_3(%arg0: i32, %arg1: i32) -> (i32, i32, i32) {
    %c0_i32 = arith.constant 0 : i32
    %c0_i32_0 = arith.constant 0 : i32
    return %arg0, %c0_i32, %arg1 : i32, i32, i32
  }
}

</mosaic_0001>

<bundles_post_ra>
// kernel: squeeze.18
= control target key start
LH: loop header
LB: loop body
LE: loop exit
PB: predicated region body
PF: predicated region fallthrough
CT: control target
= control target key end

     0   :  { %s450_s8 = smov 116   ;;  %s451_s9 = smov 108   ;;  %vm7_vm0 = vcmask 31744   ;;  %s877_s0 = inlined_call_operand.vmem [shape: f32[384], index: 0, kind: input, shape index: {}]   ;;  %s878_s1 = inlined_call_operand.vmem [shape: f32[96,4], index: 1, kind: output, shape index: {}]  }
   0x1   :  { %v4_v0 = vld [vmem:[%s877_s0] sm:$0xf]  ;;  %s449_s0 = smov 124   ;;  %s452_s10 = smov 120  }
   0x2   :  { %5 = vst [vmem:[#allocation0] sm:$0xf] %v4_v0  ;;  %s453_s11 = smov 112   ;;  %s454_s12 = smov 104  }
   0x3   :  { %s455_s13 = smov 100   ;;  %s456_s14 = smov 96  }
   0x4   :  { %s457_s15 = smov 92   ;;  %s458_s16 = smov 88  }
   0x5   :  { %s459_s17 = smov 84   ;;  %s460_s18 = smov 80  }
   0x6   :  { %s461_s19 = smov 76   ;;  %s462_s20 = smov 72  }
   0x7   :  { %s463_s21 = smov 68   ;;  %s464_s22 = smov 64  }
   0x8   :  { %s465_s23 = smov 60   ;;  %s466_s24 = smov 56  }
   0x9   :  { %v13_v1 = vld [vmem:[#allocation0] sm:$0x7]   ;;  %s467_s25 = smov 52   ;;  %s468_s26 = smov 48  }
   0xa   :  { %v33_v2 = vld [vmem:[#allocation0] sm:$0x7]   ;;  %14 = vrot.lane.b32.xlu0 %v13_v1, %s449_s0  ;;  %s469_s27 = smov 44   ;;  %s470_s28 = smov 40  }
   0xb   :  { %34 = vrot.lane.b32.xlu1 %v33_v2, %s450_s8  ;;  %v53_v3 = vld [vmem:[#allocation0] sm:$0x7]   ;;  %s471_s29 = smov 36   ;;  %s472_s30 = smov 32  }
   0xc   :  { %54 = vrot.lane.b32.xlu2 %v53_v3, %s451_s9  ;;  %v23_v4 = vld [vmem:[#allocation0] sm:$0x7]   ;;  %s473_s2 = smov 28   ;;  %s474_s3 = smov 24  }
   0xd   :  { %v43_v5 = vld [vmem:[#allocation0] sm:$0x7]   ;;  %s475_s4 = smov 20   ;;  %s476_s5 = smov 16  }
   0xe   :  { %v63_v6 = vld [vmem:[#allocation0] sm:$0x7]   ;;  %s477_s6 = smov 12   ;;  %s478_s7 = smov 8  }
   0xf   :  { %v73_v7 = vld [vmem:[#allocation0] sm:$0x7]   ;;  %s479_s0 = smov 4  }
  0x10   :  { %v83_v8 = vld [vmem:[#allocation0] sm:$0x7]  }
  0x11   :  { %v93_v9 = vld [vmem:[#allocation0] sm:$0x7]  }
  0x12   :  { %24 = vrot.lane.b32.xlu0 %v23_v4, %s452_s10  ;;  %v103_v10 = vld [vmem:[#allocation0] sm:$0x7]  }
  0x13   :  { %44 = vrot.lane.b32.xlu1 %v43_v5, %s453_s11  ;;  %v113_v11 = vld [vmem:[#allocation0] sm:$0x7]  }
  0x14   :  { %64 = vrot.lane.b32.xlu2 %v63_v6, %s454_s12  ;;  %v123_v12 = vld [vmem:[#allocation0] sm:$0x7]  }
  0x15   :  { %v133_v13 = vld [vmem:[#allocation0] sm:$0x7]  }
  0x16   :  { %v143_v14 = vld [vmem:[#allocation0] sm:$0x7]  }
  0x17   :  { %v153_v15 = vld [vmem:[#allocation0] sm:$0x7]  }
  0x18   :  { %v163_v16 = vld [vmem:[#allocation0] sm:$0x7]  }
  0x19   :  { %v173_v17 = vld [vmem:[#allocation0] sm:$0x7]  }
  0x1a   :  { %74 = vrot.lane.b32.xlu0 %v73_v7, %s455_s13  ;;  %v183_v18 = vld [vmem:[#allocation0] sm:$0x7]  }
  0x1b   :  { %84 = vrot.lane.b32.xlu1 %v83_v8, %s456_s14  ;;  %v193_v19 = vld [vmem:[#allocation0] sm:$0x7]  }
  0x1c   :  { %94 = vrot.lane.b32.xlu2 %v93_v9, %s457_s15  ;;  %v203_v20 = vld [vmem:[#allocation0] sm:$0x7]  }
  0x1d   :  { %v213_v21 = vld [vmem:[#allocation0] sm:$0x7]  }
  0x1e   :  { %v223_v22 = vld [vmem:[#allocation0] sm:$0x7]  }
  0x1f   :  { %v233_v23 = vld [vmem:[#allocation0] sm:$0x7]  }
  0x20   :  { %v243_v24 = vld [vmem:[#allocation0] sm:$0x7]  }
  0x21   :  { %v253_v25 = vld [vmem:[#allocation0] sm:$0x7]  }
  0x22   :  { %104 = vrot.lane.b32.xlu0 %v103_v10, %s458_s16  ;;  %v263_v26 = vld [vmem:[#allocation0] sm:$0x7]  }
  0x23   :  { %114 = vrot.lane.b32.xlu1 %v113_v11, %s459_s17  ;;  %v273_v27 = vld [vmem:[#allocation0] sm:$0x7]  }
  0x24   :  { %124 = vrot.lane.b32.xlu2 %v123_v12, %s460_s18  ;;  %v283_v28 = vld [vmem:[#allocation0] sm:$0x7]  }
  0x25   :  { %v293_v29 = vld [vmem:[#allocation0] sm:$0x7]  }
  0x26   :  { %v303_v30 = vld [vmem:[#allocation0] sm:$0x7]  }
  0x27   :  { %v313_v31 = vld [vmem:[#allocation0] sm:$0x7]  }
  0x28   :  { %v6_v63 = vld [vmem:[#allocation0] sm:$0x7]  }
  0x29   :  { %8 = vst.msk [vmem:[%s878_s1] sm:$0x1] %vm7_vm0, %v6_v63  }
  0x2a   :  { %134 = vrot.lane.b32.xlu0 %v133_v13, %s461_s19  ;;  %323 = vst.msk [vmem:[%s878_s1 + $0x1f] sm:$0x2] %vm7_vm0, %v6_v63  }
  0x2b   :  { %144 = vrot.lane.b32.xlu1 %v143_v14, %s462_s20  ;;  %324 = vst.msk [vmem:[%s878_s1 + $0x3e] sm:$0x4] %vm7_vm0, %v6_v63  }
  0x2c   :  { %154 = vrot.lane.b32.xlu2 %v153_v15, %s463_s21 }
  0x32   :  { %164 = vrot.lane.b32.xlu0 %v163_v16, %s464_s22 }
  0x33   :  { %174 = vrot.lane.b32.xlu1 %v173_v17, %s465_s23 }
  0x34   :  { %184 = vrot.lane.b32.xlu2 %v183_v18, %s466_s24 }
  0x3a   :  { %194 = vrot.lane.b32.xlu0 %v193_v19, %s467_s25 }
  0x3b   :  { %204 = vrot.lane.b32.xlu1 %v203_v20, %s468_s26 }
  0x3c   :  { %214 = vrot.lane.b32.xlu2 %v213_v21, %s469_s27 }
  0x42   :  { %224 = vrot.lane.b32.xlu0 %v223_v22, %s470_s28 }
  0x43   :  { %234 = vrot.lane.b32.xlu1 %v233_v23, %s471_s29 }
  0x44   :  { %244 = vrot.lane.b32.xlu2 %v243_v24, %s472_s30 }
  0x4a   :  { %254 = vrot.lane.b32.xlu0 %v253_v25, %s473_s2 }
  0x4b   :  { %264 = vrot.lane.b32.xlu1 %v263_v26, %s474_s3 }
  0x4c   :  { %274 = vrot.lane.b32.xlu2 %v273_v27, %s475_s4 }
  0x52   :  { %284 = vrot.lane.b32.xlu0 %v283_v28, %s476_s5 }
  0x53   :  { %294 = vrot.lane.b32.xlu1 %v293_v29, %s477_s6 }
  0x54   :  { %304 = vrot.lane.b32.xlu2 %v303_v30, %s478_s7 }
  0x5a   :  { %314 = vrot.lane.b32.xlu0 %v313_v31, %s479_s0 }
  0x66   :  { %v55_v32 = vpop.permute.xlu2 %54  }
  0x67   :  { %337 = vst.msk [vmem:[%s878_s1 + $0x5] sm:$0x1] %vm7_vm0, %v55_v32  }
  0x68   :  { %338 = vst.msk [vmem:[%s878_s1 + $0x24] sm:$0x2] %vm7_vm0, %v55_v32  }
  0x69   :  { %339 = vst.msk [vmem:[%s878_s1 + $0x43] sm:$0x4] %vm7_vm0, %v55_v32  }
  0x6e   :  { %v65_v33 = vpop.permute.xlu2 %64  }
  0x6f   :  { %340 = vst.msk [vmem:[%s878_s1 + $0x6] sm:$0x1] %vm7_vm0, %v65_v33  }
  0x70   :  { %341 = vst.msk [vmem:[%s878_s1 + $0x25] sm:$0x2] %vm7_vm0, %v65_v33  }
  0x71   :  { %342 = vst.msk [vmem:[%s878_s1 + $0x44] sm:$0x4] %vm7_vm0, %v65_v33  }
  0x76   :  { %v95_v34 = vpop.permute.xlu2 %94  }
  0x77   :  { %349 = vst.msk [vmem:[%s878_s1 + $0x9] sm:$0x1] %vm7_vm0, %v95_v34  }
  0x78   :  { %350 = vst.msk [vmem:[%s878_s1 + $0x28] sm:$0x2] %vm7_vm0, %v95_v34  }
  0x79   :  { %351 = vst.msk [vmem:[%s878_s1 + $0x47] sm:$0x4] %vm7_vm0, %v95_v34  }
  0x7c   :  { %v15_v35 = vpop.permute.xlu0 %14  }
  0x7d   :  { %v35_v36 = vpop.permute.xlu1 %34   ;;  %325 = vst.msk [vmem:[%s878_s1 + $0x1] sm:$0x1] %vm7_vm0, %v15_v35  }
  0x7e   :  { %326 = vst.msk [vmem:[%s878_s1 + $0x20] sm:$0x2] %vm7_vm0, %v15_v35   ;;  %v125_v37 = vpop.permute.xlu2 %124  }
  0x7f   :  { %327 = vst.msk [vmem:[%s878_s1 + $0x3f] sm:$0x4] %vm7_vm0, %v15_v35  }
  0x80   :  { %331 = vst.msk [vmem:[%s878_s1 + $0x3] sm:$0x1] %vm7_vm0, %v35_v36  }
  0x81   :  { %332 = vst.msk [vmem:[%s878_s1 + $0x22] sm:$0x2] %vm7_vm0, %v35_v36  }
  0x82   :  { %333 = vst.msk [vmem:[%s878_s1 + $0x41] sm:$0x4] %vm7_vm0, %v35_v36  }
  0x83   :  { %358 = vst.msk [vmem:[%s878_s1 + $0xc] sm:$0x1] %vm7_vm0, %v125_v37  }
  0x84   :  { %v25_v38 = vpop.permute.xlu0 %24   ;;  %359 = vst.msk [vmem:[%s878_s1 + $0x2b] sm:$0x2] %vm7_vm0, %v125_v37  }
  0x85   :  { %v45_v39 = vpop.permute.xlu1 %44   ;;  %328 = vst.msk [vmem:[%s878_s1 + $0x2] sm:$0x1] %vm7_vm0, %v25_v38  }
  0x86   :  { %329 = vst.msk [vmem:[%s878_s1 + $0x21] sm:$0x2] %vm7_vm0, %v25_v38   ;;  %v155_v40 = vpop.permute.xlu2 %154  }
  0x87   :  { %330 = vst.msk [vmem:[%s878_s1 + $0x40] sm:$0x4] %vm7_vm0, %v25_v38  }
  0x88   :  { %334 = vst.msk [vmem:[%s878_s1 + $0x4] sm:$0x1] %vm7_vm0, %v45_v39  }
  0x89   :  { %335 = vst.msk [vmem:[%s878_s1 + $0x23] sm:$0x2] %vm7_vm0, %v45_v39  }
  0x8a   :  { %336 = vst.msk [vmem:[%s878_s1 + $0x42] sm:$0x4] %vm7_vm0, %v45_v39  }
  0x8b   :  { %360 = vst.msk [vmem:[%s878_s1 + $0x4a] sm:$0x4] %vm7_vm0, %v125_v37  }
  0x8c   :  { %v75_v41 = vpop.permute.xlu0 %74   ;;  %367 = vst.msk [vmem:[%s878_s1 + $0xf] sm:$0x1] %vm7_vm0, %v155_v40  }
  0x8d   :  { %v85_v42 = vpop.permute.xlu1 %84   ;;  %343 = vst.msk [vmem:[%s878_s1 + $0x7] sm:$0x1] %vm7_vm0, %v75_v41  }
  0x8e   :  { %344 = vst.msk [vmem:[%s878_s1 + $0x26] sm:$0x2] %vm7_vm0, %v75_v41   ;;  %v185_v43 = vpop.permute.xlu2 %184  }
  0x8f   :  { %345 = vst.msk [vmem:[%s878_s1 + $0x45] sm:$0x4] %vm7_vm0, %v75_v41  }
  0x90   :  { %346 = vst.msk [vmem:[%s878_s1 + $0x8] sm:$0x1] %vm7_vm0, %v85_v42  }
  0x91   :  { %347 = vst.msk [vmem:[%s878_s1 + $0x27] sm:$0x2] %vm7_vm0, %v85_v42  }
  0x92   :  { %348 = vst.msk [vmem:[%s878_s1 + $0x46] sm:$0x4] %vm7_vm0, %v85_v42  }
  0x93   :  { %368 = vst.msk [vmem:[%s878_s1 + $0x2e] sm:$0x2] %vm7_vm0, %v155_v40  }
  0x94   :  { %v105_v44 = vpop.permute.xlu0 %104   ;;  %369 = vst.msk [vmem:[%s878_s1 + $0x4d] sm:$0x4] %vm7_vm0, %v155_v40  }
  0x95   :  { %v115_v45 = vpop.permute.xlu1 %114   ;;  %352 = vst.msk [vmem:[%s878_s1 + $0xa] sm:$0x1] %vm7_vm0, %v105_v44  }
  0x96   :  { %353 = vst.msk [vmem:[%s878_s1 + $0x29] sm:$0x2] %vm7_vm0, %v105_v44   ;;  %v215_v46 = vpop.permute.xlu2 %214  }
  0x97   :  { %354 = vst.msk [vmem:[%s878_s1 + $0x48] sm:$0x4] %vm7_vm0, %v105_v44  }
  0x98   :  { %355 = vst.msk [vmem:[%s878_s1 + $0xb] sm:$0x1] %vm7_vm0, %v115_v45  }
  0x99   :  { %356 = vst.msk [vmem:[%s878_s1 + $0x2a] sm:$0x2] %vm7_vm0, %v115_v45  }
  0x9a   :  { %357 = vst.msk [vmem:[%s878_s1 + $0x49] sm:$0x4] %vm7_vm0, %v115_v45  }
  0x9b   :  { %376 = vst.msk [vmem:[%s878_s1 + $0x12] sm:$0x1] %vm7_vm0, %v185_v43  }
  0x9c   :  { %v135_v47 = vpop.permute.xlu0 %134   ;;  %377 = vst.msk [vmem:[%s878_s1 + $0x31] sm:$0x2] %vm7_vm0, %v185_v43  }
  0x9d   :  { %v145_v48 = vpop.permute.xlu1 %144   ;;  %361 = vst.msk [vmem:[%s878_s1 + $0xd] sm:$0x1] %vm7_vm0, %v135_v47  }
  0x9e   :  { %362 = vst.msk [vmem:[%s878_s1 + $0x2c] sm:$0x2] %vm7_vm0, %v135_v47   ;;  %v245_v49 = vpop.permute.xlu2 %244  }
  0x9f   :  { %363 = vst.msk [vmem:[%s878_s1 + $0x4b] sm:$0x4] %vm7_vm0, %v135_v47  }
  0xa0   :  { %364 = vst.msk [vmem:[%s878_s1 + $0xe] sm:$0x1] %vm7_vm0, %v145_v48  }
  0xa1   :  { %365 = vst.msk [vmem:[%s878_s1 + $0x2d] sm:$0x2] %vm7_vm0, %v145_v48  }
  0xa2   :  { %366 = vst.msk [vmem:[%s878_s1 + $0x4c] sm:$0x4] %vm7_vm0, %v145_v48  }
  0xa3   :  { %378 = vst.msk [vmem:[%s878_s1 + $0x50] sm:$0x4] %vm7_vm0, %v185_v43  }
  0xa4   :  { %v165_v50 = vpop.permute.xlu0 %164   ;;  %385 = vst.msk [vmem:[%s878_s1 + $0x15] sm:$0x1] %vm7_vm0, %v215_v46  }
  0xa5   :  { %v175_v51 = vpop.permute.xlu1 %174   ;;  %370 = vst.msk [vmem:[%s878_s1 + $0x10] sm:$0x1] %vm7_vm0, %v165_v50  }
  0xa6   :  { %371 = vst.msk [vmem:[%s878_s1 + $0x2f] sm:$0x2] %vm7_vm0, %v165_v50   ;;  %v275_v52 = vpop.permute.xlu2 %274  }
  0xa7   :  { %372 = vst.msk [vmem:[%s878_s1 + $0x4e] sm:$0x4] %vm7_vm0, %v165_v50  }
  0xa8   :  { %373 = vst.msk [vmem:[%s878_s1 + $0x11] sm:$0x1] %vm7_vm0, %v175_v51  }
  0xa9   :  { %374 = vst.msk [vmem:[%s878_s1 + $0x30] sm:$0x2] %vm7_vm0, %v175_v51  }
  0xaa   :  { %375 = vst.msk [vmem:[%s878_s1 + $0x4f] sm:$0x4] %vm7_vm0, %v175_v51  }
  0xab   :  { %386 = vst.msk [vmem:[%s878_s1 + $0x34] sm:$0x2] %vm7_vm0, %v215_v46  }
  0xac   :  { %v195_v53 = vpop.permute.xlu0 %194   ;;  %387 = vst.msk [vmem:[%s878_s1 + $0x53] sm:$0x4] %vm7_vm0, %v215_v46  }
  0xad   :  { %v205_v54 = vpop.permute.xlu1 %204   ;;  %379 = vst.msk [vmem:[%s878_s1 + $0x13] sm:$0x1] %vm7_vm0, %v195_v53  }
  0xae   :  { %380 = vst.msk [vmem:[%s878_s1 + $0x32] sm:$0x2] %vm7_vm0, %v195_v53   ;;  %v305_v55 = vpop.permute.xlu2 %304  }
  0xaf   :  { %381 = vst.msk [vmem:[%s878_s1 + $0x51] sm:$0x4] %vm7_vm0, %v195_v53  }
  0xb0   :  { %382 = vst.msk [vmem:[%s878_s1 + $0x14] sm:$0x1] %vm7_vm0, %v205_v54  }
  0xb1   :  { %383 = vst.msk [vmem:[%s878_s1 + $0x33] sm:$0x2] %vm7_vm0, %v205_v54  }
  0xb2   :  { %384 = vst.msk [vmem:[%s878_s1 + $0x52] sm:$0x4] %vm7_vm0, %v205_v54  }
  0xb3   :  { %394 = vst.msk [vmem:[%s878_s1 + $0x18] sm:$0x1] %vm7_vm0, %v245_v49  }
  0xb4   :  { %v225_v56 = vpop.permute.xlu0 %224   ;;  %395 = vst.msk [vmem:[%s878_s1 + $0x37] sm:$0x2] %vm7_vm0, %v245_v49  }
  0xb5   :  { %v235_v57 = vpop.permute.xlu1 %234   ;;  %388 = vst.msk [vmem:[%s878_s1 + $0x16] sm:$0x1] %vm7_vm0, %v225_v56  }
  0xb6   :  { %389 = vst.msk [vmem:[%s878_s1 + $0x35] sm:$0x2] %vm7_vm0, %v225_v56  }
  0xb7   :  { %390 = vst.msk [vmem:[%s878_s1 + $0x54] sm:$0x4] %vm7_vm0, %v225_v56  }
  0xb8   :  { %396 = vst.msk [vmem:[%s878_s1 + $0x56] sm:$0x4] %vm7_vm0, %v245_v49  }
  0xb9   :  { %391 = vst.msk [vmem:[%s878_s1 + $0x17] sm:$0x1] %vm7_vm0, %v235_v57  }
  0xba   :  { %392 = vst.msk [vmem:[%s878_s1 + $0x36] sm:$0x2] %vm7_vm0, %v235_v57  }
  0xbb   :  { %393 = vst.msk [vmem:[%s878_s1 + $0x55] sm:$0x4] %vm7_vm0, %v235_v57  }
  0xbc   :  { %v255_v58 = vpop.permute.xlu0 %254   ;;  %403 = vst.msk [vmem:[%s878_s1 + $0x1b] sm:$0x1] %vm7_vm0, %v275_v52  }
  0xbd   :  { %v265_v59 = vpop.permute.xlu1 %264   ;;  %397 = vst.msk [vmem:[%s878_s1 + $0x19] sm:$0x1] %vm7_vm0, %v255_v58  }
  0xbe   :  { %398 = vst.msk [vmem:[%s878_s1 + $0x38] sm:$0x2] %vm7_vm0, %v255_v58  }
  0xbf   :  { %399 = vst.msk [vmem:[%s878_s1 + $0x57] sm:$0x4] %vm7_vm0, %v255_v58  }
  0xc0   :  { %404 = vst.msk [vmem:[%s878_s1 + $0x3a] sm:$0x2] %vm7_vm0, %v275_v52  }
  0xc1   :  { %405 = vst.msk [vmem:[%s878_s1 + $0x59] sm:$0x4] %vm7_vm0, %v275_v52  }
  0xc2   :  { %400 = vst.msk [vmem:[%s878_s1 + $0x1a] sm:$0x1] %vm7_vm0, %v265_v59  }
  0xc3   :  { %401 = vst.msk [vmem:[%s878_s1 + $0x39] sm:$0x2] %vm7_vm0, %v265_v59  }
  0xc4   :  { %402 = vst.msk [vmem:[%s878_s1 + $0x58] sm:$0x4] %vm7_vm0, %v265_v59   ;;  %v285_v60 = vpop.permute.xlu0 %284  }
  0xc5   :  { %v295_v61 = vpop.permute.xlu1 %294   ;;  %406 = vst.msk [vmem:[%s878_s1 + $0x1c] sm:$0x1] %vm7_vm0, %v285_v60  }
  0xc6   :  { %407 = vst.msk [vmem:[%s878_s1 + $0x3b] sm:$0x2] %vm7_vm0, %v285_v60  }
  0xc7   :  { %408 = vst.msk [vmem:[%s878_s1 + $0x5a] sm:$0x4] %vm7_vm0, %v285_v60  }
  0xc8   :  { %412 = vst.msk [vmem:[%s878_s1 + $0x1e] sm:$0x1] %vm7_vm0, %v305_v55  }
  0xc9   :  { %413 = vst.msk [vmem:[%s878_s1 + $0x3d] sm:$0x2] %vm7_vm0, %v305_v55  }
  0xca   :  { %414 = vst.msk [vmem:[%s878_s1 + $0x5c] sm:$0x4] %vm7_vm0, %v305_v55  }
  0xcb   :  { %409 = vst.msk [vmem:[%s878_s1 + $0x1d] sm:$0x1] %vm7_vm0, %v295_v61  }
  0xcc   :  { %410 = vst.msk [vmem:[%s878_s1 + $0x3c] sm:$0x2] %vm7_vm0, %v295_v61   ;;  %v315_v62 = vpop.permute.xlu0 %314  }
  0xcd   :  { %411 = vst.msk [vmem:[%s878_s1 + $0x5b] sm:$0x4] %vm7_vm0, %v295_v61  }
  0xce   :  { %415 = vst.msk [vmem:[%s878_s1 + $0x1f] sm:$0x1] %vm7_vm0, %v315_v62  }
  0xcf   :  { %416 = vst.msk [vmem:[%s878_s1 + $0x3e] sm:$0x2] %vm7_vm0, %v315_v62  }
  0xd0   :  { %417 = vst.msk [vmem:[%s878_s1 + $0x5d] sm:$0x4] %vm7_vm0, %v315_v62  }

// kernel: squeeze.16
= control target key start
LH: loop header
LB: loop body
LE: loop exit
PB: predicated region body
PF: predicated region fallthrough
CT: control target
= control target key end

     0   :  { %s354_s8 = smov 116   ;;  %s355_s9 = smov 108   ;;  %vm7_vm0 = vcmask 31744   ;;  %s653_s0 = inlined_call_operand.vmem [shape: f32[256], index: 0, kind: input, shape index: {}]   ;;  %s654_s1 = inlined_call_operand.vmem [shape: f32[64,4], index: 1, kind: output, shape index: {}]  }
   0x1   :  { %v4_v0 = vld [vmem:[%s653_s0] sm:$0x3]  ;;  %s353_s0 = smov 124   ;;  %s356_s10 = smov 120  }
   0x2   :  { %5 = vst [vmem:[#allocation0] sm:$0x3] %v4_v0  ;;  %s357_s11 = smov 112   ;;  %s358_s12 = smov 104  }
   0x3   :  { %s359_s13 = smov 100   ;;  %s360_s14 = smov 96  }
   0x4   :  { %s361_s15 = smov 92   ;;  %s362_s16 = smov 88  }
   0x5   :  { %s363_s17 = smov 84   ;;  %s364_s18 = smov 80  }
   0x6   :  { %s365_s19 = smov 76   ;;  %s366_s20 = smov 72  }
   0x7   :  { %s367_s21 = smov 68   ;;  %s368_s22 = smov 64  }
   0x8   :  { %s369_s23 = smov 60   ;;  %s370_s24 = smov 56  }
   0x9   :  { %v11_v1 = vld [vmem:[#allocation0] sm:$0x3]   ;;  %s371_s25 = smov 52   ;;  %s372_s26 = smov 48  }
   0xa   :  { %v27_v2 = vld [vmem:[#allocation0] sm:$0x3]   ;;  %12 = vrot.lane.b32.xlu0 %v11_v1, %s353_s0  ;;  %s373_s27 = smov 44   ;;  %s374_s28 = smov 40  }
   0xb   :  { %28 = vrot.lane.b32.xlu1 %v27_v2, %s354_s8  ;;  %v43_v3 = vld [vmem:[#allocation0] sm:$0x3]   ;;  %s375_s29 = smov 36   ;;  %s376_s30 = smov 32  }
   0xc   :  { %44 = vrot.lane.b32.xlu2 %v43_v3, %s355_s9  ;;  %v19_v4 = vld [vmem:[#allocation0] sm:$0x3]   ;;  %s377_s2 = smov 28   ;;  %s378_s3 = smov 24  }
   0xd   :  { %v35_v5 = vld [vmem:[#allocation0] sm:$0x3]   ;;  %s379_s4 = smov 20   ;;  %s380_s5 = smov 16  }
   0xe   :  { %v51_v6 = vld [vmem:[#allocation0] sm:$0x3]   ;;  %s381_s6 = smov 12   ;;  %s382_s7 = smov 8  }
   0xf   :  { %v59_v7 = vld [vmem:[#allocation0] sm:$0x3]   ;;  %s383_s0 = smov 4  }
  0x10   :  { %v67_v8 = vld [vmem:[#allocation0] sm:$0x3]  }
  0x11   :  { %v75_v9 = vld [vmem:[#allocation0] sm:$0x3]  }
  0x12   :  { %20 = vrot.lane.b32.xlu0 %v19_v4, %s356_s10  ;;  %v83_v10 = vld [vmem:[#allocation0] sm:$0x3]  }
  0x13   :  { %36 = vrot.lane.b32.xlu1 %v35_v5, %s357_s11  ;;  %v91_v11 = vld [vmem:[#allocation0] sm:$0x3]  }
  0x14   :  { %52 = vrot.lane.b32.xlu2 %v51_v6, %s358_s12  ;;  %v99_v12 = vld [vmem:[#allocation0] sm:$0x3]  }
  0x15   :  { %v107_v13 = vld [vmem:[#allocation0] sm:$0x3]  }
  0x16   :  { %v115_v14 = vld [vmem:[#allocation0] sm:$0x3]  }
  0x17   :  { %v123_v15 = vld [vmem:[#allocation0] sm:$0x3]  }
  0x18   :  { %v131_v16 = vld [vmem:[#allocation0] sm:$0x3]  }
  0x19   :  { %v139_v17 = vld [vmem:[#allocation0] sm:$0x3]  }
  0x1a   :  { %60 = vrot.lane.b32.xlu0 %v59_v7, %s359_s13  ;;  %v147_v18 = vld [vmem:[#allocation0] sm:$0x3]  }
  0x1b   :  { %68 = vrot.lane.b32.xlu1 %v67_v8, %s360_s14  ;;  %v155_v19 = vld [vmem:[#allocation0] sm:$0x3]  }
  0x1c   :  { %76 = vrot.lane.b32.xlu2 %v75_v9, %s361_s15  ;;  %v163_v20 = vld [vmem:[#allocation0] sm:$0x3]  }
  0x1d   :  { %v171_v21 = vld [vmem:[#allocation0] sm:$0x3]  }
  0x1e   :  { %v179_v22 = vld [vmem:[#allocation0] sm:$0x3]  }
  0x1f   :  { %v187_v23 = vld [vmem:[#allocation0] sm:$0x3]  }
  0x20   :  { %v195_v24 = vld [vmem:[#allocation0] sm:$0x3]  }
  0x21   :  { %v203_v25 = vld [vmem:[#allocation0] sm:$0x3]  }
  0x22   :  { %84 = vrot.lane.b32.xlu0 %v83_v10, %s362_s16  ;;  %v211_v26 = vld [vmem:[#allocation0] sm:$0x3]  }
  0x23   :  { %92 = vrot.lane.b32.xlu1 %v91_v11, %s363_s17  ;;  %v219_v27 = vld [vmem:[#allocation0] sm:$0x3]  }
  0x24   :  { %100 = vrot.lane.b32.xlu2 %v99_v12, %s364_s18  ;;  %v227_v28 = vld [vmem:[#allocation0] sm:$0x3]  }
  0x25   :  { %v235_v29 = vld [vmem:[#allocation0] sm:$0x3]  }
  0x26   :  { %v243_v30 = vld [vmem:[#allocation0] sm:$0x3]  }
  0x27   :  { %v251_v31 = vld [vmem:[#allocation0] sm:$0x3]  }
  0x28   :  { %v6_v56 = vld [vmem:[#allocation0] sm:$0x3]  }
  0x29   :  { %8 = vst.msk [vmem:[%s654_s1] sm:$0x1] %vm7_vm0, %v6_v56  }
  0x2a   :  { %108 = vrot.lane.b32.xlu0 %v107_v13, %s365_s19  ;;  %259 = vst.msk [vmem:[%s654_s1 + $0x1f] sm:$0x2] %vm7_vm0, %v6_v56  }
  0x2b   :  { %116 = vrot.lane.b32.xlu1 %v115_v14, %s366_s20 }
  0x2c   :  { %124 = vrot.lane.b32.xlu2 %v123_v15, %s367_s21 }
  0x32   :  { %132 = vrot.lane.b32.xlu0 %v131_v16, %s368_s22 }
  0x33   :  { %140 = vrot.lane.b32.xlu1 %v139_v17, %s369_s23 }
  0x34   :  { %148 = vrot.lane.b32.xlu2 %v147_v18, %s370_s24 }
  0x3a   :  { %156 = vrot.lane.b32.xlu0 %v155_v19, %s371_s25 }
  0x3b   :  { %164 = vrot.lane.b32.xlu1 %v163_v20, %s372_s26 }
  0x3c   :  { %172 = vrot.lane.b32.xlu2 %v171_v21, %s373_s27 }
  0x42   :  { %180 = vrot.lane.b32.xlu0 %v179_v22, %s374_s28 }
  0x43   :  { %188 = vrot.lane.b32.xlu1 %v187_v23, %s375_s29 }
  0x44   :  { %196 = vrot.lane.b32.xlu2 %v195_v24, %s376_s30 }
  0x4a   :  { %204 = vrot.lane.b32.xlu0 %v203_v25, %s377_s2 }
  0x4b   :  { %212 = vrot.lane.b32.xlu1 %v211_v26, %s378_s3 }
  0x4c   :  { %220 = vrot.lane.b32.xlu2 %v219_v27, %s379_s4 }
  0x52   :  { %228 = vrot.lane.b32.xlu0 %v227_v28, %s380_s5 }
  0x53   :  { %236 = vrot.lane.b32.xlu1 %v235_v29, %s381_s6 }
  0x54   :  { %244 = vrot.lane.b32.xlu2 %v243_v30, %s382_s7 }
  0x5a   :  { %252 = vrot.lane.b32.xlu0 %v251_v31, %s383_s0 }
  0x66   :  { %v45_v32 = vpop.permute.xlu2 %44  }
  0x67   :  { %268 = vst.msk [vmem:[%s654_s1 + $0x5] sm:$0x1] %vm7_vm0, %v45_v32  }
  0x68   :  { %269 = vst.msk [vmem:[%s654_s1 + $0x24] sm:$0x2] %vm7_vm0, %v45_v32  }
  0x6e   :  { %v53_v33 = vpop.permute.xlu2 %52  }
  0x6f   :  { %270 = vst.msk [vmem:[%s654_s1 + $0x6] sm:$0x1] %vm7_vm0, %v53_v33  }
  0x70   :  { %271 = vst.msk [vmem:[%s654_s1 + $0x25] sm:$0x2] %vm7_vm0, %v53_v33  }
  0x76   :  { %v77_v34 = vpop.permute.xlu2 %76  }
  0x77   :  { %276 = vst.msk [vmem:[%s654_s1 + $0x9] sm:$0x1] %vm7_vm0, %v77_v34  }
  0x78   :  { %277 = vst.msk [vmem:[%s654_s1 + $0x28] sm:$0x2] %vm7_vm0, %v77_v34  }
  0x7c   :  { %v13_v35 = vpop.permute.xlu0 %12  }
  0x7d   :  { %v29_v36 = vpop.permute.xlu1 %28   ;;  %260 = vst.msk [vmem:[%s654_s1 + $0x1] sm:$0x1] %vm7_vm0, %v13_v35  }
  0x7e   :  { %261 = vst.msk [vmem:[%s654_s1 + $0x20] sm:$0x2] %vm7_vm0, %v13_v35   ;;  %v101_v37 = vpop.permute.xlu2 %100  }
  0x7f   :  { %264 = vst.msk [vmem:[%s654_s1 + $0x3] sm:$0x1] %vm7_vm0, %v29_v36  }
  0x80   :  { %265 = vst.msk [vmem:[%s654_s1 + $0x22] sm:$0x2] %vm7_vm0, %v29_v36  }
  0x81   :  { %282 = vst.msk [vmem:[%s654_s1 + $0xc] sm:$0x1] %vm7_vm0, %v101_v37  }
  0x82   :  { %283 = vst.msk [vmem:[%s654_s1 + $0x2b] sm:$0x2] %vm7_vm0, %v101_v37  }
  0x84   :  { %v21_v38 = vpop.permute.xlu0 %20  }
  0x85   :  { %v37_v39 = vpop.permute.xlu1 %36   ;;  %262 = vst.msk [vmem:[%s654_s1 + $0x2] sm:$0x1] %vm7_vm0, %v21_v38  }
  0x86   :  { %263 = vst.msk [vmem:[%s654_s1 + $0x21] sm:$0x2] %vm7_vm0, %v21_v38   ;;  %v125_v40 = vpop.permute.xlu2 %124  }
  0x87   :  { %266 = vst.msk [vmem:[%s654_s1 + $0x4] sm:$0x1] %vm7_vm0, %v37_v39  }
  0x88   :  { %267 = vst.msk [vmem:[%s654_s1 + $0x23] sm:$0x2] %vm7_vm0, %v37_v39  }
  0x89   :  { %288 = vst.msk [vmem:[%s654_s1 + $0xf] sm:$0x1] %vm7_vm0, %v125_v40  }
  0x8a   :  { %289 = vst.msk [vmem:[%s654_s1 + $0x2e] sm:$0x2] %vm7_vm0, %v125_v40  }
  0x8c   :  { %v61_v41 = vpop.permute.xlu0 %60  }
  0x8d   :  { %v69_v42 = vpop.permute.xlu1 %68   ;;  %272 = vst.msk [vmem:[%s654_s1 + $0x7] sm:$0x1] %vm7_vm0, %v61_v41  }
  0x8e   :  { %273 = vst.msk [vmem:[%s654_s1 + $0x26] sm:$0x2] %vm7_vm0, %v61_v41   ;;  %v149_v43 = vpop.permute.xlu2 %148  }
  0x8f   :  { %274 = vst.msk [vmem:[%s654_s1 + $0x8] sm:$0x1] %vm7_vm0, %v69_v42  }
  0x90   :  { %275 = vst.msk [vmem:[%s654_s1 + $0x27] sm:$0x2] %vm7_vm0, %v69_v42  }
  0x91   :  { %294 = vst.msk [vmem:[%s654_s1 + $0x12] sm:$0x1] %vm7_vm0, %v149_v43  }
  0x92   :  { %295 = vst.msk [vmem:[%s654_s1 + $0x31] sm:$0x2] %vm7_vm0, %v149_v43  }
  0x94   :  { %v85_v44 = vpop.permute.xlu0 %84  }
  0x95   :  { %v93_v45 = vpop.permute.xlu1 %92   ;;  %278 = vst.msk [vmem:[%s654_s1 + $0xa] sm:$0x1] %vm7_vm0, %v85_v44  }
  0x96   :  { %279 = vst.msk [vmem:[%s654_s1 + $0x29] sm:$0x2] %vm7_vm0, %v85_v44   ;;  %v173_v46 = vpop.permute.xlu2 %172  }
  0x97   :  { %280 = vst.msk [vmem:[%s654_s1 + $0xb] sm:$0x1] %vm7_vm0, %v93_v45  }
  0x98   :  { %281 = vst.msk [vmem:[%s654_s1 + $0x2a] sm:$0x2] %vm7_vm0, %v93_v45  }
  0x99   :  { %300 = vst.msk [vmem:[%s654_s1 + $0x15] sm:$0x1] %vm7_vm0, %v173_v46  }
  0x9a   :  { %301 = vst.msk [vmem:[%s654_s1 + $0x34] sm:$0x2] %vm7_vm0, %v173_v46  }
  0x9c   :  { %v109_v47 = vpop.permute.xlu0 %108  }
  0x9d   :  { %v117_v48 = vpop.permute.xlu1 %116   ;;  %284 = vst.msk [vmem:[%s654_s1 + $0xd] sm:$0x1] %vm7_vm0, %v109_v47  }
  0x9e   :  { %285 = vst.msk [vmem:[%s654_s1 + $0x2c] sm:$0x2] %vm7_vm0, %v109_v47   ;;  %v197_v49 = vpop.permute.xlu2 %196  }
  0x9f   :  { %286 = vst.msk [vmem:[%s654_s1 + $0xe] sm:$0x1] %vm7_vm0, %v117_v48  }
  0xa0   :  { %287 = vst.msk [vmem:[%s654_s1 + $0x2d] sm:$0x2] %vm7_vm0, %v117_v48  }
  0xa1   :  { %306 = vst.msk [vmem:[%s654_s1 + $0x18] sm:$0x1] %vm7_vm0, %v197_v49  }
  0xa2   :  { %307 = vst.msk [vmem:[%s654_s1 + $0x37] sm:$0x2] %vm7_vm0, %v197_v49  }
  0xa4   :  { %v133_v50 = vpop.permute.xlu0 %132  }
  0xa5   :  { %v141_v51 = vpop.permute.xlu1 %140   ;;  %290 = vst.msk [vmem:[%s654_s1 + $0x10] sm:$0x1] %vm7_vm0, %v133_v50  }
  0xa6   :  { %291 = vst.msk [vmem:[%s654_s1 + $0x2f] sm:$0x2] %vm7_vm0, %v133_v50   ;;  %v221_v52 = vpop.permute.xlu2 %220  }
  0xa7   :  { %292 = vst.msk [vmem:[%s654_s1 + $0x11] sm:$0x1] %vm7_vm0, %v141_v51  }
  0xa8   :  { %293 = vst.msk [vmem:[%s654_s1 + $0x30] sm:$0x2] %vm7_vm0, %v141_v51  }
  0xa9   :  { %312 = vst.msk [vmem:[%s654_s1 + $0x1b] sm:$0x1] %vm7_vm0, %v221_v52  }
  0xaa   :  { %313 = vst.msk [vmem:[%s654_s1 + $0x3a] sm:$0x2] %vm7_vm0, %v221_v52  }
  0xac   :  { %v157_v53 = vpop.permute.xlu0 %156  }
  0xad   :  { %v165_v54 = vpop.permute.xlu1 %164   ;;  %296 = vst.msk [vmem:[%s654_s1 + $0x13] sm:$0x1] %vm7_vm0, %v157_v53  }
  0xae   :  { %297 = vst.msk [vmem:[%s654_s1 + $0x32] sm:$0x2] %vm7_vm0, %v157_v53   ;;  %v245_v55 = vpop.permute.xlu2 %244  }
  0xaf   :  { %298 = vst.msk [vmem:[%s654_s1 + $0x14] sm:$0x1] %vm7_vm0, %v165_v54  }
  0xb0   :  { %299 = vst.msk [vmem:[%s654_s1 + $0x33] sm:$0x2] %vm7_vm0, %v165_v54  }
  0xb1   :  { %318 = vst.msk [vmem:[%s654_s1 + $0x1e] sm:$0x1] %vm7_vm0, %v245_v55  }
  0xb2   :  { %319 = vst.msk [vmem:[%s654_s1 + $0x3d] sm:$0x2] %vm7_vm0, %v245_v55  }
  0xb4   :  { %v181_v57 = vpop.permute.xlu0 %180  }
  0xb5   :  { %v189_v58 = vpop.permute.xlu1 %188   ;;  %302 = vst.msk [vmem:[%s654_s1 + $0x16] sm:$0x1] %vm7_vm0, %v181_v57  }
  0xb6   :  { %303 = vst.msk [vmem:[%s654_s1 + $0x35] sm:$0x2] %vm7_vm0, %v181_v57  }
  0xb7   :  { %304 = vst.msk [vmem:[%s654_s1 + $0x17] sm:$0x1] %vm7_vm0, %v189_v58  }
  0xb8   :  { %305 = vst.msk [vmem:[%s654_s1 + $0x36] sm:$0x2] %vm7_vm0, %v189_v58  }
  0xbc   :  { %v205_v59 = vpop.permute.xlu0 %204  }
  0xbd   :  { %v213_v60 = vpop.permute.xlu1 %212   ;;  %308 = vst.msk [vmem:[%s654_s1 + $0x19] sm:$0x1] %vm7_vm0, %v205_v59  }
  0xbe   :  { %309 = vst.msk [vmem:[%s654_s1 + $0x38] sm:$0x2] %vm7_vm0, %v205_v59  }
  0xbf   :  { %310 = vst.msk [vmem:[%s654_s1 + $0x1a] sm:$0x1] %vm7_vm0, %v213_v60  }
  0xc0   :  { %311 = vst.msk [vmem:[%s654_s1 + $0x39] sm:$0x2] %vm7_vm0, %v213_v60  }
  0xc4   :  { %v229_v61 = vpop.permute.xlu0 %228  }
  0xc5   :  { %v237_v62 = vpop.permute.xlu1 %236   ;;  %314 = vst.msk [vmem:[%s654_s1 + $0x1c] sm:$0x1] %vm7_vm0, %v229_v61  }
  0xc6   :  { %315 = vst.msk [vmem:[%s654_s1 + $0x3b] sm:$0x2] %vm7_vm0, %v229_v61  }
  0xc7   :  { %316 = vst.msk [vmem:[%s654_s1 + $0x1d] sm:$0x1] %vm7_vm0, %v237_v62  }
  0xc8   :  { %317 = vst.msk [vmem:[%s654_s1 + $0x3c] sm:$0x2] %vm7_vm0, %v237_v62  }
  0xcc   :  { %v253_v63 = vpop.permute.xlu0 %252  }
  0xcd   :  { %320 = vst.msk [vmem:[%s654_s1 + $0x1f] sm:$0x1] %vm7_vm0, %v253_v63  }
  0xce   :  { %321 = vst.msk [vmem:[%s654_s1 + $0x3e] sm:$0x2] %vm7_vm0, %v253_v63  }

// kernel: squeeze.22
= control target key start
LH: loop header
LB: loop body
LE: loop exit
PB: predicated region body
PF: predicated region fallthrough
CT: control target
= control target key end

     0   :  { %s114_s0 = inlined_call_operand.vmem [shape: f32[384], index: 0, kind: input, shape index: {}]   ;;  %s115_s1 = inlined_call_operand.hbm [shape: f32[4,96], index: 1, kind: output, shape index: {}]  }
   0x1   :  { %v5_v0 = vld [vmem:[%s114_s0] sm:$0xf] }
   0x2   :  { %6 = vst [vmem:[#allocation3] sm:$0xf] %v5_v0 }
   0x3   :  { %2 = vsyncpa [#allocation1], 0  ;;  %vm21_vm0 = vcmask 523264   ;;  %s92_s0 = smov 64   ;;  %s93_s8 = smov 96   ;;  %vm8_vm1 = vcmask 785408  }
   0x4   :  { %s94_s9 = smov 32   ;;  %vm28_vm2 = vcmask 785920   ;;  %vm38_vm3 = vcmask 261120   ;;  %vm41_vm4 = vcmask 785664   ;;  %s95_s10 = smov [#allocation0]  }
   0x5   :  { %s53_s11 = sshll.u32 %s95_s10, 4  ;;  %s55_s1 = sshll.u32 %s115_s1, 4  ;;  %s54_s11 = int_to_ptr.vmem [resolvable:$true] %s53_s11  ;;  %s56_s1 = int_to_ptr.hbm [resolvable:$true] %s55_s1 }
   0x9   :  { %v18_v1 = vld [vmem:[#allocation3 + $0x1] sm:$0x1]   ;;  %v20_v2 = vld [vmem:[#allocation3 + $0x2] sm:$0x1]   ;;  %v31_v5 = vld [vmem:[#allocation3] sm:$0x1]  }
   0xa   :  { %v22_v3 = vsel %vm21_vm0, %v20_v2, %v18_v1  ;;  %v11_v4 = vld [vmem:[#allocation3 + $0x2] sm:$0x1]   ;;  %v33_v6 = vld [vmem:[#allocation3 + $0x1] sm:$0x1]   ;;  %v7_v8 = vld [vmem:[#allocation3] sm:$0x1]  }
   0xb   :  { %23 = vrot.lane.b32.xlu0 %v22_v3, %s92_s0  ;;  %12 = vrot.lane.b32.xlu1 %v11_v4, %s93_s8  ;;  %v35_v7 = vsel %vm8_vm1, %v33_v6, %v31_v5  ;;  %9 = vst.msk [vmem:[#allocation2] sm:$0x1] %vm8_vm1, %v7_v8  }
  0x13   :  { %36 = vrot.lane.b32.xlu0 %v35_v7, %s94_s9 }
  0x7d   :  { %v24_v9 = vpop.permute.xlu0 %23   ;;  %v13_v10 = vpop.permute.xlu1 %12  }
  0x7e   :  { %27 = vst.msk [vmem:[#allocation2 + $0x2] sm:$0x1] %vm21_vm0, %v24_v9  }
  0x7f   :  { %30 = vst.msk [vmem:[#allocation2 + $0x2] sm:$0x1] %vm28_vm2, %v24_v9  }
  0x80   :  { %16 = vst.msk [vmem:[#allocation2 + $0x3] sm:$0x1] %vm8_vm1, %v13_v10  }
  0x85   :  { %v37_v11 = vpop.permute.xlu0 %36  }
  0x86   :  { %40 = vst.msk [vmem:[#allocation2 + $0x1] sm:$0x1] %vm38_vm3, %v37_v11  }
  0x87   :  { %43 = vst.msk [vmem:[#allocation2 + $0x1] sm:$0x1] %vm41_vm4, %v37_v11  }
  0x8e   :  { %v46_v12 = vld [vmem:[#allocation2] sm:$0xf] }
  0x8f   :  { %49 = vst [vmem:[#allocation0] sm:$0xf] %v46_v12 }
  0x90   :  { %58 = dma.vmem_to_hbm [thread:$0]  %s54_s11, 64, %s56_s1, [#allocation1]  }
  0x91   :  { %90 = dma.done.wait [#allocation1], 64  }
  0x92   :  { %91 = vsyncadd [#allocation1], 4294967232 }
  0x93   :  { %61 = vsyncpa [#allocation1], 1 }

// kernel: squeeze.12
= control target key start
LH: loop header
LB: loop body
LE: loop exit
PB: predicated region body
PF: predicated region fallthrough
CT: control target
= control target key end

     0   :  { %s80_s0 = inlined_call_operand.vmem [shape: f32[256], index: 0, kind: input, shape index: {}]   ;;  %s81_s1 = inlined_call_operand.hbm [shape: f32[4,64], index: 1, kind: output, shape index: {}]  }
   0x1   :  { %v5_v0 = vld [vmem:[%s80_s0] sm:$0x3] }
   0x2   :  { %2 = vsyncpa [#allocation1], 0  ;;  %6 = vst [vmem:[#allocation3] sm:$0x3] %v5_v0  ;;  %vm8_vm0 = vcmask 523264   ;;  %s62_s0 = smov 64  }
   0x3   :  { %s63_s8 = smov [#allocation0]   ;;  %s27_s1 = sshll.u32 %s81_s1, 4  ;;  %s28_s1 = int_to_ptr.hbm [resolvable:$true] %s27_s1 }
   0x4   :  { %s25_s9 = sshll.u32 %s63_s8, 4  ;;  %s26_s9 = int_to_ptr.vmem [resolvable:$true] %s25_s9 }
   0x9   :  { %v10_v1 = vld [vmem:[#allocation3] sm:$0x3]  }
   0xa   :  { %v7_v2 = vld [vmem:[#allocation3] sm:$0x3]   ;;  %11 = vrot.lane.b32.xlu0 %v10_v1, %s62_s0 }
   0xb   :  { %9 = vst.msk [vmem:[#allocation2] ss:$2 sm:$0x3] %vm8_vm0, %v7_v2  }
  0x7c   :  { %v12_v3 = vpop.permute.xlu0 %11  }
  0x7d   :  { %15 = vst.msk [vmem:[#allocation2 + $0x1] ss:$2 sm:$0x3] %vm8_vm0, %v12_v3  }
  0x84   :  { %v18_v4 = vld [vmem:[#allocation2] sm:$0xf] }
  0x85   :  { %21 = vst [vmem:[#allocation0] sm:$0xf] %v18_v4 }
  0x86   :  { %30 = dma.vmem_to_hbm [thread:$0]  %s26_s9, 64, %s28_s1, [#allocation1]  }
  0x87   :  { %60 = dma.done.wait [#allocation1], 64  }
  0x88   :  { %61 = vsyncadd [#allocation1], 4294967232 }
  0x89   :  { %33 = vsyncpa [#allocation1], 1 }

// kernel: forward.3
= control target key start
LH: loop header
LB: loop body
LE: loop exit
PB: predicated region body
PF: predicated region fallthrough
CT: control target
= control target key end

     0   :  { %vm64_vm0 = vcmask 261120   ;;  %vm133_vm1 = vcmask 1040384   ;;  %vm135_vm2 = vcmask 1041408   ;;  %s1551_s1 = inlined_call_operand.vmem [shape: f32[6,128,32], index: 1, kind: input, shape index: {}]   ;;  %s1552_s2 = inlined_call_operand.vmem [shape: f32[6,32,384], index: 2, kind: input, shape index: {}]   ;;  %s1553_s0 = inlined_call_operand.vmem [shape: f32[6,1,128], index: 0, kind: input, shape index: {}]   ;;  %s1554_s3 = inlined_call_operand.vmem [shape: f32[6,1,384], index: 3, kind: output, shape index: {}]  }
   0x1   :  { %v30_v0 = vld [vmem:[%s1551_s1 + $0x78] sm:$0xff]  ;;  %v29_v1 = vld [vmem:[%s1551_s1 + $0x70] sm:$0xff]  ;;  %v28_v2 = vld [vmem:[%s1551_s1 + $0x68] sm:$0xff] }
   0x2   :  { %31 = vmatpush.msra.mxu0 %v30_v0  ;;  %v796_v3 = vld [vmem:[%s1551_s1 + $0xf8] sm:$0xff]  ;;  %v795_v4 = vld [vmem:[%s1551_s1 + $0xf0] sm:$0xff]  ;;  %v27_v5 = vld [vmem:[%s1551_s1 + $0x60] sm:$0xff] }
   0x3   :  { %162 = vmatpush.msra.mxu1 %v796_v3  ;;  %v794_v6 = vld [vmem:[%s1551_s1 + $0xe8] sm:$0xff]  ;;  %v26_v7 = vld [vmem:[%s1551_s1 + $0x58] sm:$0xff]  ;;  %v793_v8 = vld [vmem:[%s1551_s1 + $0xe0] sm:$0xff] }
   0x4   :  { %32 = vmatpush.msra.mxu0 %v29_v1  ;;  %v25_v9 = vld [vmem:[%s1551_s1 + $0x50] sm:$0xff]  ;;  %v792_v10 = vld [vmem:[%s1551_s1 + $0xd8] sm:$0xff]  ;;  %v24_v11 = vld [vmem:[%s1551_s1 + $0x48] sm:$0xff] }
   0x5   :  { %163 = vmatpush.msra.mxu1 %v795_v4  ;;  %v791_v12 = vld [vmem:[%s1551_s1 + $0xd0] sm:$0xff]  ;;  %v63_v13 = vld [vmem:[%s1552_s2 + $0x58] sm:$0xff]  ;;  %v60_v14 = vld [vmem:[%s1552_s2 + $0x40] sm:$0xff] }
   0x6   :  { %33 = vmatpush.msra.mxu0 %v28_v2  ;;  %v23_v15 = vld [vmem:[%s1551_s1 + $0x40] sm:$0xff]  ;;  %v790_v16 = vld [vmem:[%s1551_s1 + $0xc8] sm:$0xff]  ;;  %120 = vmatpush.msra.mxu3 %v63_v13  ;;  %v62_v18 = vld [vmem:[%s1552_s2 + $0x50] sm:$0xff] }
   0x7   :  { %164 = vmatpush.msra.mxu1 %v794_v6  ;;  %v57_v17 = vld [vmem:[%s1552_s2 + $0x28] sm:$0xff]  ;;  %v22_v19 = vld [vmem:[%s1551_s1 + $0x38] sm:$0xff]  ;;  %v789_v20 = vld [vmem:[%s1551_s1 + $0xc0] sm:$0xff]  ;;  %100 = vmatpush.msra.mxu2 %v62_v18 }
   0x8   :  { %34 = vmatpush.msra.mxu0 %v27_v5  ;;  %121 = vmatpush.msra.mxu3 %v60_v14  ;;  %v59_v21 = vld [vmem:[%s1552_s2 + $0x38] sm:$0xff]  ;;  %v54_v22 = vld [vmem:[%s1552_s2 + $0x10] sm:$0xff]  ;;  %v20_v26 = vld [vmem:[%s1551_s1 + $0x28] sm:$0xff] }
   0x9   :  { %165 = vmatpush.msra.mxu1 %v793_v8  ;;  %v21_v23 = vld [vmem:[%s1551_s1 + $0x30] sm:$0xff]  ;;  %v788_v24 = vld [vmem:[%s1551_s1 + $0xb8] sm:$0xff]  ;;  %101 = vmatpush.msra.mxu2 %v59_v21  ;;  %v19_v29 = vld [vmem:[%s1551_s1 + $0x20] sm:$0xff] }
   0xa   :  { %35 = vmatpush.msra.mxu0 %v26_v7  ;;  %122 = vmatpush.msra.mxu3 %v57_v17  ;;  %v807_v25 = vld [vmem:[%s1552_s2 + $0xb0] sm:$0xff]  ;;  %v804_v28 = vld [vmem:[%s1552_s2 + $0x98] sm:$0xff]  ;;  %v786_v30 = vld [vmem:[%s1551_s1 + $0xa8] sm:$0xff] }
   0xb   :  { %166 = vmatpush.msra.mxu1 %v792_v10  ;;  %v787_v27 = vld [vmem:[%s1551_s1 + $0xb0] sm:$0xff]  ;;  %v18_v31 = vld [vmem:[%s1551_s1 + $0x18] sm:$0xff]  ;;  %v785_v32 = vld [vmem:[%s1551_s1 + $0xa0] sm:$0xff] }
   0xc   :  { %36 = vmatpush.msra.mxu0 %v25_v9  ;;  %123 = vmatpush.msra.mxu3 %v54_v22  ;;  %v17_v33 = vld [vmem:[%s1551_s1 + $0x10] sm:$0xff]  ;;  %v784_v34 = vld [vmem:[%s1551_s1 + $0x98] sm:$0xff]  ;;  %v16_v35 = vld [vmem:[%s1551_s1 + $0x8] sm:$0xff] }
   0xd   :  { %167 = vmatpush.msra.mxu1 %v791_v12  ;;  %v783_v36 = vld [vmem:[%s1551_s1 + $0x90] sm:$0xff]  ;;  %v15_v37 = vld [vmem:[%s1551_s1] sm:$0xff]  ;;  %v782_v38 = vld [vmem:[%s1551_s1 + $0x88] sm:$0xff] }
   0xe   :  { %37 = vmatpush.msra.mxu0 %v24_v11  ;;  %231 = vmatpush.msrb.mxu3 %v807_v25  ;;  %v14_v39 = vld [vmem:[%s1553_s0] sm:$0x1]  ;;  %v61_v41 = vld [vmem:[%s1552_s2 + $0x48] sm:$0xff]  ;;  %v780_v42 = vld [vmem:[%s1553_s0 + $0x1] sm:$0x1] }
   0xf   :  { %168 = vmatpush.msra.mxu1 %v790_v16  ;;  %v781_v40 = vld [vmem:[%s1551_s1 + $0x80] sm:$0xff]  ;;  %v58_v43 = vld [vmem:[%s1552_s2 + $0x30] sm:$0xff]  ;;  %v55_v44 = vld [vmem:[%s1552_s2 + $0x18] sm:$0xff] }
  0x10   :  { %38 = vmatpush.msra.mxu0 %v23_v15  ;;  %232 = vmatpush.msrb.mxu3 %v804_v28  ;;  %v56_v45 = vld [vmem:[%s1552_s2 + $0x20] sm:$0xff]  ;;  %v53_v48 = vld [vmem:[%s1552_s2 + $0x8] sm:$0xff]  ;;  %v803_v51 = vld [vmem:[%s1552_s2 + $0x90] sm:$0xff] }
  0x11   :  { %169 = vmatpush.msra.mxu1 %v789_v20  ;;  %v801_v46 = vld [vmem:[%s1552_s2 + $0x80] sm:$0xff]  ;;  %102 = vmatpush.msra.mxu2 %v56_v45  ;;  %v798_v49 = vld [vmem:[%s1552_s2 + $0x68] sm:$0xff]  ;;  %v800_v52 = vld [vmem:[%s1552_s2 + $0x78] sm:$0xff] }
  0x12   :  { %39 = vmatpush.msra.mxu0 %v22_v19  ;;  %233 = vmatpush.msrb.mxu3 %v801_v46  ;;  %v52_v47 = vld [vmem:[%s1552_s2] sm:$0xff]  ;;  %v806_v50 = vld [vmem:[%s1552_s2 + $0xa8] sm:$0xff]  ;;  %v808_v56 = vld [vmem:[%s1552_s2 + $0xb8] sm:$0xff] }
  0x13   :  { %170 = vmatpush.msra.mxu1 %v788_v24  ;;  %103 = vmatpush.msra.mxu2 %v53_v48  ;;  %v797_v53 = vld [vmem:[%s1552_s2 + $0x60] sm:$0xff]  ;;  %v829_v57 = vld [vmem:[%s1551_s1 + $0x178] sm:$0xff]  ;;  %v828_v59 = vld [vmem:[%s1551_s1 + $0x170] sm:$0xff] }
  0x14   :  { %40 = vmatpush.msra.mxu0 %v21_v23  ;;  %234 = vmatpush.msrb.mxu3 %v798_v49  ;;  %v805_v58 = vld [vmem:[%s1552_s2 + $0xa0] sm:$0xff]  ;;  %v802_v61 = vld [vmem:[%s1552_s2 + $0x88] sm:$0xff]  ;;  %v799_v0 = vld [vmem:[%s1552_s2 + $0x70] sm:$0xff] }
  0x15   :  { %171 = vmatpush.msra.mxu1 %v787_v27  ;;  %211 = vmatpush.msrb.mxu2 %v806_v50  ;;  %v827_v62 = vld [vmem:[%s1551_s1 + $0x168] sm:$0xff]  ;;  %v826_v1 = vld [vmem:[%s1551_s1 + $0x160] sm:$0xff]  ;;  %v825_v2 = vld [vmem:[%s1551_s1 + $0x158] sm:$0xff] }
  0x16   :  { %41 = vmatpush.msra.mxu0 %v20_v26  ;;  %v824_v3 = vld [vmem:[%s1551_s1 + $0x150] sm:$0xff]  ;;  %v823_v4 = vld [vmem:[%s1551_s1 + $0x148] sm:$0xff]  ;;  %v822_v5 = vld [vmem:[%s1551_s1 + $0x140] sm:$0xff] }
  0x17   :  { %172 = vmatpush.msra.mxu1 %v786_v30  ;;  %212 = vmatpush.msrb.mxu2 %v803_v51  ;;  %v821_v6 = vld [vmem:[%s1551_s1 + $0x138] sm:$0xff]  ;;  %v820_v7 = vld [vmem:[%s1551_s1 + $0x130] sm:$0xff]  ;;  %v819_v8 = vld [vmem:[%s1551_s1 + $0x128] sm:$0xff] }
  0x18   :  { %42 = vmatpush.msra.mxu0 %v19_v29  ;;  %v818_v9 = vld [vmem:[%s1551_s1 + $0x120] sm:$0xff]  ;;  %v817_v10 = vld [vmem:[%s1551_s1 + $0x118] sm:$0xff]  ;;  %v816_v11 = vld [vmem:[%s1551_s1 + $0x110] sm:$0xff] }
  0x19   :  { %173 = vmatpush.msra.mxu1 %v785_v32  ;;  %213 = vmatpush.msrb.mxu2 %v800_v52  ;;  %v815_v12 = vld [vmem:[%s1551_s1 + $0x108] sm:$0xff]  ;;  %v814_v13 = vld [vmem:[%s1551_s1 + $0x100] sm:$0xff]  ;;  %v840_v15 = vld [vmem:[%s1552_s2 + $0x110] sm:$0xff] }
  0x1a   :  { %43 = vmatpush.msra.mxu0 %v18_v31  ;;  %v813_v14 = vld [vmem:[%s1553_s0 + $0x2] sm:$0x1]  ;;  %v837_v16 = vld [vmem:[%s1552_s2 + $0xf8] sm:$0xff]  ;;  %v831_v18 = vld [vmem:[%s1552_s2 + $0xc8] sm:$0xff]  ;;  %v138_v31 = vlaneseq }
  0x1b   :  { %174 = vmatpush.msra.mxu1 %v784_v34  ;;  %214 = vmatpush.msrb.mxu2 %v797_v53  ;;  %v834_v17 = vld [vmem:[%s1552_s2 + $0xe0] sm:$0xff]  ;;  %v862_v19 = vld [vmem:[%s1551_s1 + $0x1f8] sm:$0xff]  ;;  %v861_v20 = vld [vmem:[%s1551_s1 + $0x1f0] sm:$0xff] }
  0x1c   :  { %44 = vmatpush.msra.mxu0 %v17_v33  ;;  %v860_v21 = vld [vmem:[%s1551_s1 + $0x1e8] sm:$0xff]  ;;  %v859_v22 = vld [vmem:[%s1551_s1 + $0x1e0] sm:$0xff]  ;;  %v858_v23 = vld [vmem:[%s1551_s1 + $0x1d8] sm:$0xff]  ;;  %vm1250_vm3 = vcmp.lt.s32.totalorder %v138_v31, 384 }
  0x1d   :  { %175 = vmatpush.msra.mxu1 %v783_v36  ;;  %v857_v24 = vld [vmem:[%s1551_s1 + $0x1d0] sm:$0xff]  ;;  %v839_v25 = vld [vmem:[%s1552_s2 + $0x108] sm:$0xff]  ;;  %v855_v28 = vld [vmem:[%s1551_s1 + $0x1c0] sm:$0xff] }
  0x1e   :  { %45 = vmatpush.msra.mxu0 %v16_v35  ;;  %v836_v26 = vld [vmem:[%s1552_s2 + $0xf0] sm:$0xff]  ;;  %v856_v27 = vld [vmem:[%s1551_s1 + $0x1c8] sm:$0xff]  ;;  %v854_v29 = vld [vmem:[%s1551_s1 + $0x1b8] sm:$0xff] }
  0x1f   :  { %176 = vmatpush.msra.mxu1 %v782_v38  ;;  %v853_v30 = vld [vmem:[%s1551_s1 + $0x1b0] sm:$0xff]  ;;  %v833_v33 = vld [vmem:[%s1552_s2 + $0xd8] sm:$0xff]  ;;  %v852_v34 = vld [vmem:[%s1551_s1 + $0x1a8] sm:$0xff] }
  0x20   :  { %46 = vmatpush.msra.mxu0 %v15_v37  ;;  %v850_v45 = vld [vmem:[%s1551_s1 + $0x198] sm:$0xff]  ;;  %v838_v46 = vld [vmem:[%s1552_s2 + $0x100] sm:$0xff]  ;;  %v835_v48 = vld [vmem:[%s1552_s2 + $0xe8] sm:$0xff] }
  0x21   :  { %47 = vmatmul.f32.vlgmr.msra.gmra.mxu0 %v14_v39  ;;  %177 = vmatpush.msra.mxu1 %v781_v40  ;;  %v830_v40 = vld [vmem:[%s1552_s2 + $0xc0] sm:$0xff]  ;;  %v848_v49 = vld [vmem:[%s1551_s1 + $0x188] sm:$0xff]  ;;  %v832_v51 = vld [vmem:[%s1552_s2 + $0xd0] sm:$0xff] }
  0x22   :  { %80 = vmatpush.msrb.mxu0 %v61_v41  ;;  %178 = vmatmul.f32.vlgmr.msra.gmra.mxu1 %v780_v42  ;;  %v851_v41 = vld [vmem:[%s1551_s1 + $0x1a0] sm:$0xff]  ;;  %v903_v31 = vld [vmem:[%s1552_s2 + $0x1b8] sm:$0xff] }
  0x23   :  { %v847_v52 = vld [vmem:[%s1551_s1 + $0x180] sm:$0xff] }
  0x24   :  { %81 = vmatpush.msrb.mxu0 %v58_v43 }
  0x26   :  { %82 = vmatpush.msrb.mxu0 %v55_v44  ;;  %v841_v44 = vld [vmem:[%s1552_s2 + $0x118] sm:$0xff] }
  0x28   :  { %83 = vmatpush.msrb.mxu0 %v52_v47  ;;  %v849_v47 = vld [vmem:[%s1551_s1 + $0x190] sm:$0xff] }
  0x2a   :  { %357 = vmatpush.msra.mxu0 %v840_v15  ;;  %v885_v15 = vld [vmem:[%s1551_s1 + $0x228] sm:$0xff] }
  0x2c   :  { %358 = vmatpush.msra.mxu0 %v837_v16  ;;  %v863_v16 = vld [vmem:[%s1552_s2 + $0x120] sm:$0xff] }
  0x2e   :  { %359 = vmatpush.msra.mxu0 %v834_v17  ;;  %v884_v17 = vld [vmem:[%s1551_s1 + $0x220] sm:$0xff] }
  0x30   :  { %360 = vmatpush.msra.mxu0 %v831_v18  ;;  %v874_v18 = vld [vmem:[%s1552_s2 + $0x178] sm:$0xff] }
  0x9e   :  { %v48_v54 = vpop.f32.mrf.mxu0 }
  0x9f   :  { %v51_v55 = vmax.f32 %v48_v54, 0.0  ;;  %v179_v60 = vpop.f32.mrf.mxu1 }
  0xa0   :  { %v182_v63 = vmax.f32 %v179_v60, 0.0 }
  0xa1   :  { %777 = vmatmul.msk.f32.vlgmr.msrb.gmra.mxu0 %vm64_vm0, %v51_v55  ;;  %778 = vmatmul.msk.f32.vlgmr.msra.gmra.mxu2 %vm64_vm0, %v51_v55 }
  0xa2   :  { %779 = vmatmul.msk.f32.vlgmr.msra.gmra.mxu3 %vm64_vm0, %v51_v55  ;;  %251 = vmatpush.msra.mxu2 %v808_v56 }
  0xa3   :  { %288 = vmatpush.msra.mxu3 %v829_v57  ;;  %414 = vmatpush.msrb.mxu0 %v862_v19  ;;  %v883_v19 = vld [vmem:[%s1551_s1 + $0x218] sm:$0xff] }
  0xa4   :  { %252 = vmatpush.msra.mxu2 %v805_v58 }
  0xa5   :  { %289 = vmatpush.msra.mxu3 %v828_v59  ;;  %415 = vmatpush.msrb.mxu0 %v861_v20  ;;  %v871_v20 = vld [vmem:[%s1552_s2 + $0x160] sm:$0xff] }
  0xa6   :  { %253 = vmatpush.msra.mxu2 %v802_v61  ;;  %v873_v61 = vld [vmem:[%s1552_s2 + $0x170] sm:$0xff] }
  0xa7   :  { %290 = vmatpush.msra.mxu3 %v827_v62  ;;  %416 = vmatpush.msrb.mxu0 %v860_v21  ;;  %v870_v62 = vld [vmem:[%s1552_s2 + $0x158] sm:$0xff]  ;;  %v882_v21 = vld [vmem:[%s1551_s1 + $0x210] sm:$0xff] }
  0xa8   :  { %254 = vmatpush.msra.mxu2 %v799_v0  ;;  %v864_v0 = vld [vmem:[%s1552_s2 + $0x128] sm:$0xff] }
  0xa9   :  { %291 = vmatpush.msra.mxu3 %v826_v1  ;;  %809 = vmatmul.msk.f32.vlgmr.msrb.gmra.mxu2 %vm64_vm0, %v182_v63  ;;  %v846_v1 = vld [vmem:[%s1553_s0 + $0x3] sm:$0x1] }
  0xaa   :  { %810 = vmatmul.msk.f32.vlgmr.msrb.gmra.mxu3 %vm64_vm0, %v182_v63  ;;  %417 = vmatpush.msrb.mxu0 %v859_v22  ;;  %v868_v22 = vld [vmem:[%s1552_s2 + $0x148] sm:$0xff] }
  0xab   :  { %292 = vmatpush.msra.mxu3 %v825_v2  ;;  %337 = vmatpush.msrb.mxu2 %v839_v25  ;;  %v895_v2 = vld [vmem:[%s1551_s1 + $0x278] sm:$0xff]  ;;  %v880_v25 = vld [vmem:[%s1551_s1 + $0x200] sm:$0xff] }
  0xac   :  { %418 = vmatpush.msrb.mxu0 %v858_v23  ;;  %v881_v23 = vld [vmem:[%s1551_s1 + $0x208] sm:$0xff] }
  0xad   :  { %293 = vmatpush.msra.mxu3 %v824_v3  ;;  %338 = vmatpush.msrb.mxu2 %v836_v26  ;;  %v894_v3 = vld [vmem:[%s1551_s1 + $0x270] sm:$0xff] }
  0xae   :  { %419 = vmatpush.msrb.mxu0 %v857_v24  ;;  %v865_v24 = vld [vmem:[%s1552_s2 + $0x130] sm:$0xff] }
  0xaf   :  { %294 = vmatpush.msra.mxu3 %v823_v4  ;;  %339 = vmatpush.msrb.mxu2 %v833_v33  ;;  %v893_v4 = vld [vmem:[%s1551_s1 + $0x268] sm:$0xff] }
  0xb0   :  { %420 = vmatpush.msrb.mxu0 %v856_v27 }
  0xb1   :  { %295 = vmatpush.msra.mxu3 %v822_v5  ;;  %811 = vmatmul.msk.f32.vlgmr.msra.gmra.mxu2 %vm64_vm0, %v182_v63  ;;  %v867_v63 = vld [vmem:[%s1552_s2 + $0x140] sm:$0xff] }
  0xb2   :  { %421 = vmatpush.msrb.mxu0 %v855_v28  ;;  %340 = vmatpush.msrb.mxu2 %v830_v40  ;;  %v892_v5 = vld [vmem:[%s1551_s1 + $0x260] sm:$0xff] }
  0xb3   :  { %296 = vmatpush.msra.mxu3 %v821_v6  ;;  %v891_v6 = vld [vmem:[%s1551_s1 + $0x258] sm:$0xff] }
  0xb4   :  { %422 = vmatpush.msrb.mxu0 %v854_v29  ;;  %377 = vmatpush.msra.mxu2 %v841_v44  ;;  %v925_v44 = vld [vmem:[%s1551_s1 + $0x2e0] sm:$0xff] }
  0xb5   :  { %297 = vmatpush.msra.mxu3 %v820_v7  ;;  %v890_v7 = vld [vmem:[%s1551_s1 + $0x250] sm:$0xff] }
  0xb6   :  { %423 = vmatpush.msrb.mxu0 %v853_v30  ;;  %378 = vmatpush.msra.mxu2 %v838_v46  ;;  %v906_v30 = vld [vmem:[%s1552_s2 + $0x1d0] sm:$0xff] }
  0xb7   :  { %298 = vmatpush.msra.mxu3 %v819_v8  ;;  %v889_v8 = vld [vmem:[%s1551_s1 + $0x248] sm:$0xff]  ;;  %v923_v46 = vld [vmem:[%s1551_s1 + $0x2d0] sm:$0xff] }
  0xb8   :  { %424 = vmatpush.msrb.mxu0 %v852_v34  ;;  %379 = vmatpush.msra.mxu2 %v835_v48  ;;  %v921_v48 = vld [vmem:[%s1551_s1 + $0x2c0] sm:$0xff] }
  0xb9   :  { %299 = vmatpush.msra.mxu3 %v818_v9  ;;  %v888_v9 = vld [vmem:[%s1551_s1 + $0x240] sm:$0xff] }
  0xba   :  { %425 = vmatpush.msrb.mxu0 %v851_v41  ;;  %380 = vmatpush.msra.mxu2 %v832_v51  ;;  %v928_v41 = vld [vmem:[%s1551_s1 + $0x2f8] sm:$0xff]  ;;  %v902_v51 = vld [vmem:[%s1552_s2 + $0x1b0] sm:$0xff] }
  0xbb   :  { %300 = vmatpush.msra.mxu3 %v817_v10  ;;  %v872_v10 = vld [vmem:[%s1552_s2 + $0x168] sm:$0xff] }
  0xbc   :  { %426 = vmatpush.msrb.mxu0 %v850_v45  ;;  %463 = vmatpush.msrb.mxu1 %v872_v10  ;;  %v924_v45 = vld [vmem:[%s1551_s1 + $0x2d8] sm:$0xff]  ;;  %v912_v10 = vld [vmem:[%s1553_s0 + $0x5] sm:$0x1] }
  0xbd   :  { %301 = vmatpush.msra.mxu3 %v816_v11  ;;  %v887_v11 = vld [vmem:[%s1551_s1 + $0x238] sm:$0xff] }
  0xbe   :  { %427 = vmatpush.msrb.mxu0 %v849_v47  ;;  %v922_v47 = vld [vmem:[%s1551_s1 + $0x2c8] sm:$0xff] }
  0xbf   :  { %302 = vmatpush.msra.mxu3 %v815_v12  ;;  %v869_v12 = vld [vmem:[%s1552_s2 + $0x150] sm:$0xff] }
  0xc0   :  { %428 = vmatpush.msrb.mxu0 %v848_v49  ;;  %464 = vmatpush.msrb.mxu1 %v869_v12  ;;  %v905_v49 = vld [vmem:[%s1552_s2 + $0x1c8] sm:$0xff]  ;;  %v939_v12 = vld [vmem:[%s1552_s2 + $0x230] sm:$0xff] }
  0xc1   :  { %303 = vmatpush.msra.mxu3 %v814_v13  ;;  %v886_v13 = vld [vmem:[%s1551_s1 + $0x230] sm:$0xff] }
  0xc2   :  { %304 = vmatmul.f32.vlgmr.msra.gmra.mxu3 %v813_v14  ;;  %429 = vmatpush.msrb.mxu0 %v847_v52  ;;  %v866_v14 = vld [vmem:[%s1552_s2 + $0x138] sm:$0xff]  ;;  %v919_v52 = vld [vmem:[%s1551_s1 + $0x2b0] sm:$0xff] }
  0xc3   :  { %465 = vmatpush.msrb.mxu1 %v866_v14  ;;  %589 = vmatpush.msrb.mxu3 %v905_v49  ;;  %v936_v14 = vld [vmem:[%s1552_s2 + $0x218] sm:$0xff] }
  0xc5   :  { %466 = vmatpush.msrb.mxu1 %v863_v16  ;;  %590 = vmatpush.msrb.mxu3 %v902_v51  ;;  %v933_v16 = vld [vmem:[%s1552_s2 + $0x200] sm:$0xff] }
  0xc7   :  { %503 = vmatpush.msra.mxu1 %v874_v18  ;;  %v930_v18 = vld [vmem:[%s1552_s2 + $0x1e8] sm:$0xff] }
  0xc9   :  { %504 = vmatpush.msra.mxu1 %v871_v20  ;;  %v937_v20 = vld [vmem:[%s1552_s2 + $0x220] sm:$0xff] }
  0xcb   :  { %505 = vmatpush.msra.mxu1 %v868_v22  ;;  %v931_v22 = vld [vmem:[%s1552_s2 + $0x1f0] sm:$0xff] }
  0xcd   :  { %506 = vmatpush.msra.mxu1 %v865_v24 }
 0x11e   :  { %v85_v37 = vpop.f32.mrf.mxu0 }
 0x124   :  { %v105_v32 = vpop.f32.mrf.mxu2 }
 0x125   :  { %v131_v35 = vrot.slane %v105_v32, 7  ;;  %v125_v36 = vpop.f32.mrf.mxu3  ;;  %v900_v32 = vld [vmem:[%s1552_s2 + $0x1a0] sm:$0xff] }
 0x126   :  { %v132_v38 = vrot.slane %v125_v36, 6  ;;  %v897_v36 = vld [vmem:[%s1552_s2 + $0x188] sm:$0xff] }
 0x127   :  { %v134_v42 = vsel %vm133_vm1, %v85_v37, %v131_v35 }
 0x128   :  { %v136_v43 = vsel %vm135_vm2, %v134_v42, %v132_v38  ;;  %v879_v38 = vld [vmem:[%s1553_s0 + $0x4] sm:$0x1]  ;;  %v927_v42 = vld [vmem:[%s1551_s1 + $0x2f0] sm:$0xff] }
 0x129   :  { %142 = vst.msk [vmem:[%s1554_s3] sm:$0x7] %vm1250_vm3, %v136_v43  ;;  %v926_v43 = vld [vmem:[%s1551_s1 + $0x2e8] sm:$0xff] }
 0x12c   :  { %v216_v50 = vpop.f32.mrf.mxu2 }
 0x12d   :  { %v236_v53 = vpop.f32.mrf.mxu3 }
 0x12e   :  { %v262_v54 = vrot.slane %v236_v53, 7  ;;  %v899_v53 = vld [vmem:[%s1552_s2 + $0x198] sm:$0xff] }
 0x12f   :  { %591 = vmatpush.msrb.mxu3 %v899_v53 }
 0x130   :  { %v264_v55 = vsel %vm133_vm1, %v216_v50, %v262_v54  ;;  %v920_v50 = vld [vmem:[%s1551_s1 + $0x2b8] sm:$0xff]  ;;  %v918_v54 = vld [vmem:[%s1551_s1 + $0x2a8] sm:$0xff] }
 0x134   :  { %v256_v56 = vpop.f32.mrf.mxu2 }
 0x135   :  { %v263_v57 = vrot.slane %v256_v56, 6  ;;  %v917_v56 = vld [vmem:[%s1551_s1 + $0x2a0] sm:$0xff] }
 0x137   :  { %v265_v58 = vsel %vm135_vm2, %v264_v55, %v263_v57  ;;  %v896_v55 = vld [vmem:[%s1552_s2 + $0x180] sm:$0xff]  ;;  %v907_v57 = vld [vmem:[%s1552_s2 + $0x1d8] sm:$0xff] }
 0x138   :  { %812 = vst.msk [vmem:[%s1554_s3 + $0x3] sm:$0x7] %vm1250_vm3, %v265_v58  ;;  %592 = vmatpush.msrb.mxu3 %v896_v55  ;;  %v916_v58 = vld [vmem:[%s1551_s1 + $0x298] sm:$0xff] }
 0x13a   :  { %629 = vmatpush.msra.mxu3 %v907_v57 }
 0x145   :  { %v305_v59 = vpop.f32.mrf.mxu3 }
 0x146   :  { %v308_v60 = vmax.f32 %v305_v59, 0.0  ;;  %v904_v59 = vld [vmem:[%s1552_s2 + $0x1c0] sm:$0xff] }
 0x147   :  { %630 = vmatpush.msra.mxu3 %v904_v59 }
 0x148   :  { %842 = vmatmul.msk.f32.vlgmr.msrb.gmra.mxu2 %vm64_vm0, %v308_v60  ;;  %843 = vmatmul.msk.f32.vlgmr.msra.gmra.mxu0 %vm64_vm0, %v308_v60 }
 0x149   :  { %483 = vmatpush.msrb.mxu2 %v873_v61  ;;  %v901_v61 = vld [vmem:[%s1552_s2 + $0x1a8] sm:$0xff]  ;;  %735 = vmatpush.msra.mxu0 %v939_v12 }
 0x14a   :  { %631 = vmatpush.msra.mxu3 %v901_v61 }
 0x14b   :  { %484 = vmatpush.msrb.mxu2 %v870_v62  ;;  %v914_v62 = vld [vmem:[%s1551_s1 + $0x288] sm:$0xff]  ;;  %736 = vmatpush.msra.mxu0 %v936_v14 }
 0x14d   :  { %485 = vmatpush.msrb.mxu2 %v867_v63  ;;  %v898_v63 = vld [vmem:[%s1552_s2 + $0x190] sm:$0xff]  ;;  %737 = vmatpush.msra.mxu0 %v933_v16 }
 0x14e   :  { %632 = vmatpush.msra.mxu3 %v898_v63 }
 0x14f   :  { %486 = vmatpush.msrb.mxu2 %v864_v0  ;;  %v913_v0 = vld [vmem:[%s1551_s1 + $0x280] sm:$0xff]  ;;  %738 = vmatpush.msra.mxu0 %v930_v18 }
 0x150   :  { %844 = vmatmul.msk.f32.vlgmr.msra.gmra.mxu2 %vm64_vm0, %v308_v60  ;;  %430 = vmatmul.f32.vlgmr.msrb.gmra.mxu0 %v846_v1  ;;  %v915_v60 = vld [vmem:[%s1551_s1 + $0x290] sm:$0xff] }
 0x151   :  { %540 = vmatpush.msra.mxu2 %v895_v2 }
 0x153   :  { %541 = vmatpush.msra.mxu2 %v894_v3 }
 0x155   :  { %542 = vmatpush.msra.mxu2 %v893_v4 }
 0x157   :  { %543 = vmatpush.msra.mxu2 %v892_v5 }
 0x159   :  { %544 = vmatpush.msra.mxu2 %v891_v6 }
 0x15b   :  { %545 = vmatpush.msra.mxu2 %v890_v7 }
 0x15d   :  { %546 = vmatpush.msra.mxu2 %v889_v8 }
 0x15f   :  { %547 = vmatpush.msra.mxu2 %v888_v9 }
 0x161   :  { %548 = vmatpush.msra.mxu2 %v887_v11  ;;  %v938_v11 = vld [vmem:[%s1552_s2 + $0x228] sm:$0xff] }
 0x163   :  { %549 = vmatpush.msra.mxu2 %v886_v13  ;;  %v935_v13 = vld [vmem:[%s1552_s2 + $0x210] sm:$0xff] }
 0x165   :  { %550 = vmatpush.msra.mxu2 %v885_v15  ;;  %v932_v15 = vld [vmem:[%s1552_s2 + $0x1f8] sm:$0xff] }
 0x167   :  { %551 = vmatpush.msra.mxu2 %v884_v17  ;;  %v929_v17 = vld [vmem:[%s1552_s2 + $0x1e0] sm:$0xff] }
 0x169   :  { %552 = vmatpush.msra.mxu2 %v883_v19  ;;  %v940_v19 = vld [vmem:[%s1552_s2 + $0x238] sm:$0xff] }
 0x16b   :  { %553 = vmatpush.msra.mxu2 %v882_v21  ;;  %v934_v21 = vld [vmem:[%s1552_s2 + $0x208] sm:$0xff] }
 0x16d   :  { %554 = vmatpush.msra.mxu2 %v881_v23 }
 0x16f   :  { %555 = vmatpush.msra.mxu2 %v880_v25 }
 0x1c5   :  { %v362_v26 = vpop.f32.mrf.mxu0 }
 0x1c6   :  { %v388_v33 = vrot.slane %v362_v26, 7 }
 0x1cb   :  { %v342_v27 = vpop.f32.mrf.mxu2 }
 0x1cc   :  { %v390_v37 = vsel %vm133_vm1, %v342_v27, %v388_v33 }
 0x1cd   :  { %v431_v28 = vpop.f32.mrf.mxu0 }
 0x1ce   :  { %v434_v29 = vmax.f32 %v431_v28, 0.0 }
 0x1d0   :  { %875 = vmatmul.msk.f32.vlgmr.msrb.gmra.mxu1 %vm64_vm0, %v434_v29  ;;  %876 = vmatmul.msk.f32.vlgmr.msrb.gmra.mxu2 %vm64_vm0, %v434_v29 }
 0x1d1   :  { %609 = vmatpush.msrb.mxu1 %v906_v30 }
 0x1d3   :  { %v382_v34 = vpop.f32.mrf.mxu2  ;;  %610 = vmatpush.msrb.mxu1 %v903_v31 }
 0x1d4   :  { %v389_v35 = vrot.slane %v382_v34, 6 }
 0x1d5   :  { %611 = vmatpush.msrb.mxu1 %v900_v32 }
 0x1d6   :  { %v391_v40 = vsel %vm135_vm2, %v390_v37, %v389_v35 }
 0x1d7   :  { %845 = vst.msk [vmem:[%s1554_s3 + $0x6] sm:$0x7] %vm1250_vm3, %v391_v40  ;;  %612 = vmatpush.msrb.mxu1 %v897_v36 }
 0x1d8   :  { %877 = vmatmul.msk.f32.vlgmr.msra.gmra.mxu1 %vm64_vm0, %v434_v29  ;;  %556 = vmatmul.f32.vlgmr.msra.gmra.mxu2 %v879_v38 }
 0x1d9   :  { %666 = vmatpush.msra.mxu1 %v928_v41 }
 0x1db   :  { %667 = vmatpush.msra.mxu1 %v927_v42 }
 0x1dd   :  { %668 = vmatpush.msra.mxu1 %v926_v43 }
 0x1df   :  { %669 = vmatpush.msra.mxu1 %v925_v44 }
 0x1e1   :  { %670 = vmatpush.msra.mxu1 %v924_v45 }
 0x1e3   :  { %671 = vmatpush.msra.mxu1 %v923_v46 }
 0x1e5   :  { %672 = vmatpush.msra.mxu1 %v922_v47 }
 0x1e7   :  { %673 = vmatpush.msra.mxu1 %v921_v48 }
 0x1e9   :  { %674 = vmatpush.msra.mxu1 %v920_v50 }
 0x1eb   :  { %675 = vmatpush.msra.mxu1 %v919_v52 }
 0x1ed   :  { %676 = vmatpush.msra.mxu1 %v918_v54 }
 0x1ef   :  { %677 = vmatpush.msra.mxu1 %v917_v56 }
 0x1f1   :  { %678 = vmatpush.msra.mxu1 %v916_v58 }
 0x1f3   :  { %679 = vmatpush.msra.mxu1 %v915_v60 }
 0x1f5   :  { %680 = vmatpush.msra.mxu1 %v914_v62 }
 0x1f7   :  { %681 = vmatpush.msra.mxu1 %v913_v0 }
 0x24d   :  { %v468_v1 = vpop.f32.mrf.mxu1 }
 0x253   :  { %v488_v2 = vpop.f32.mrf.mxu2 }
 0x254   :  { %v514_v3 = vrot.slane %v488_v2, 7 }
 0x255   :  { %v508_v4 = vpop.f32.mrf.mxu1 }
 0x256   :  { %v516_v5 = vsel %vm133_vm1, %v468_v1, %v514_v3  ;;  %v515_v6 = vrot.slane %v508_v4, 6 }
 0x258   :  { %v517_v7 = vsel %vm135_vm2, %v516_v5, %v515_v6 }
 0x259   :  { %878 = vst.msk [vmem:[%s1554_s3 + $0x9] sm:$0x7] %vm1250_vm3, %v517_v7 }
 0x25b   :  { %v557_v8 = vpop.f32.mrf.mxu2 }
 0x25c   :  { %v560_v9 = vmax.f32 %v557_v8, 0.0 }
 0x25e   :  { %908 = vmatmul.msk.f32.vlgmr.msrb.gmra.mxu3 %vm64_vm0, %v560_v9  ;;  %909 = vmatmul.msk.f32.vlgmr.msrb.gmra.mxu1 %vm64_vm0, %v560_v9 }
 0x25f   :  { %715 = vmatpush.msrb.mxu3 %v938_v11 }
 0x261   :  { %716 = vmatpush.msrb.mxu3 %v935_v13 }
 0x263   :  { %717 = vmatpush.msrb.mxu3 %v932_v15 }
 0x265   :  { %718 = vmatpush.msrb.mxu3 %v929_v17 }
 0x266   :  { %910 = vmatmul.msk.f32.vlgmr.msra.gmra.mxu3 %vm64_vm0, %v560_v9  ;;  %682 = vmatmul.f32.vlgmr.msra.gmra.mxu1 %v912_v10 }
 0x267   :  { %755 = vmatpush.msra.mxu3 %v940_v19 }
 0x269   :  { %756 = vmatpush.msra.mxu3 %v937_v20 }
 0x26b   :  { %757 = vmatpush.msra.mxu3 %v934_v21 }
 0x26d   :  { %758 = vmatpush.msra.mxu3 %v931_v22 }
 0x2db   :  { %v614_v23 = vpop.f32.mrf.mxu1 }
 0x2dc   :  { %v640_v27 = vrot.slane %v614_v23, 7 }
 0x2e1   :  { %v594_v24 = vpop.f32.mrf.mxu3 }
 0x2e2   :  { %v642_v30 = vsel %vm133_vm1, %v594_v24, %v640_v27 }
 0x2e3   :  { %v683_v25 = vpop.f32.mrf.mxu1 }
 0x2e4   :  { %v686_v26 = vmax.f32 %v683_v25, 0.0 }
 0x2e6   :  { %941 = vmatmul.msk.f32.vlgmr.msrb.gmra.mxu3 %vm64_vm0, %v686_v26  ;;  %942 = vmatmul.msk.f32.vlgmr.msra.gmra.mxu0 %vm64_vm0, %v686_v26 }
 0x2e9   :  { %v634_v28 = vpop.f32.mrf.mxu3 }
 0x2ea   :  { %v641_v29 = vrot.slane %v634_v28, 6 }
 0x2ec   :  { %v643_v31 = vsel %vm135_vm2, %v642_v30, %v641_v29 }
 0x2ed   :  { %911 = vst.msk [vmem:[%s1554_s3 + $0xc] sm:$0x7] %vm1250_vm3, %v643_v31 }
 0x2ee   :  { %943 = vmatmul.msk.f32.vlgmr.msra.gmra.mxu3 %vm64_vm0, %v686_v26 }
 0x363   :  { %v740_v33 = vpop.f32.mrf.mxu0 }
 0x364   :  { %v766_v34 = vrot.slane %v740_v33, 7 }
 0x369   :  { %v720_v32 = vpop.f32.mrf.mxu3 }
 0x36a   :  { %v768_v37 = vsel %vm133_vm1, %v720_v32, %v766_v34 }
 0x371   :  { %v760_v35 = vpop.f32.mrf.mxu3 }
 0x372   :  { %v767_v36 = vrot.slane %v760_v35, 6 }
 0x374   :  { %v769_v38 = vsel %vm135_vm2, %v768_v37, %v767_v36 }
 0x375   :  { %944 = vst.msk [vmem:[%s1554_s3 + $0xf] sm:$0x7] %vm1250_vm3, %v769_v38 }

// kernel: forward.2
= control target key start
LH: loop header
LB: loop body
LE: loop exit
PB: predicated region body
PF: predicated region fallthrough
CT: control target
= control target key end

     0   :  { %vm60_vm0 = vcmask 261120   ;;  %vm107_vm1 = vcmask 1040384   ;;  %s1278_s1 = inlined_call_operand.vmem [shape: f32[6,128,32], index: 1, kind: input, shape index: {}]   ;;  %s1279_s2 = inlined_call_operand.vmem [shape: f32[6,32,256], index: 2, kind: input, shape index: {}]   ;;  %s1280_s0 = inlined_call_operand.vmem [shape: f32[6,1,128], index: 0, kind: input, shape index: {}]   ;;  %s1281_s3 = inlined_call_operand.vmem [shape: f32[6,1,256], index: 3, kind: output, shape index: {}]  }
   0x1   :  { %v30_v0 = vld [vmem:[%s1278_s1 + $0x78] sm:$0xff]  ;;  %v29_v1 = vld [vmem:[%s1278_s1 + $0x70] sm:$0xff]  ;;  %v28_v3 = vld [vmem:[%s1278_s1 + $0x68] sm:$0xff] }
   0x2   :  { %31 = vmatpush.msra.mxu0 %v30_v0  ;;  %v632_v2 = vld [vmem:[%s1278_s1 + $0xf8] sm:$0xff]  ;;  %v631_v4 = vld [vmem:[%s1278_s1 + $0xf0] sm:$0xff]  ;;  %v630_v5 = vld [vmem:[%s1278_s1 + $0xe8] sm:$0xff] }
   0x3   :  { %134 = vmatpush.msra.mxu3 %v632_v2  ;;  %v27_v6 = vld [vmem:[%s1278_s1 + $0x60] sm:$0xff]  ;;  %v26_v8 = vld [vmem:[%s1278_s1 + $0x58] sm:$0xff]  ;;  %v25_v10 = vld [vmem:[%s1278_s1 + $0x50] sm:$0xff] }
   0x4   :  { %32 = vmatpush.msra.mxu0 %v29_v1  ;;  %v629_v7 = vld [vmem:[%s1278_s1 + $0xe0] sm:$0xff]  ;;  %v628_v9 = vld [vmem:[%s1278_s1 + $0xd8] sm:$0xff]  ;;  %v627_v11 = vld [vmem:[%s1278_s1 + $0xd0] sm:$0xff] }
   0x5   :  { %135 = vmatpush.msra.mxu3 %v631_v4  ;;  %v24_v12 = vld [vmem:[%s1278_s1 + $0x48] sm:$0xff]  ;;  %v58_v14 = vld [vmem:[%s1279_s2 + $0x30] sm:$0xff]  ;;  %v56_v15 = vld [vmem:[%s1279_s2 + $0x20] sm:$0xff] }
   0x6   :  { %33 = vmatpush.msra.mxu0 %v28_v3  ;;  %v626_v13 = vld [vmem:[%s1278_s1 + $0xc8] sm:$0xff]  ;;  %v23_v16 = vld [vmem:[%s1278_s1 + $0x40] sm:$0xff]  ;;  %76 = vmatpush.msra.mxu1 %v58_v14  ;;  %v59_v17 = vld [vmem:[%s1279_s2 + $0x38] sm:$0xff] }
   0x7   :  { %136 = vmatpush.msra.mxu3 %v630_v5  ;;  %v625_v18 = vld [vmem:[%s1278_s1 + $0xc0] sm:$0xff]  ;;  %v54_v19 = vld [vmem:[%s1279_s2 + $0x10] sm:$0xff]  ;;  %96 = vmatpush.msra.mxu2 %v59_v17  ;;  %v57_v20 = vld [vmem:[%s1279_s2 + $0x28] sm:$0xff] }
   0x8   :  { %34 = vmatpush.msra.mxu0 %v27_v6  ;;  %v22_v21 = vld [vmem:[%s1278_s1 + $0x38] sm:$0xff]  ;;  %77 = vmatpush.msra.mxu1 %v56_v15  ;;  %v52_v23 = vld [vmem:[%s1279_s2] sm:$0xff]  ;;  %v21_v24 = vld [vmem:[%s1278_s1 + $0x30] sm:$0xff] }
   0x9   :  { %137 = vmatpush.msra.mxu3 %v629_v7  ;;  %v624_v22 = vld [vmem:[%s1278_s1 + $0xb8] sm:$0xff]  ;;  %97 = vmatpush.msra.mxu2 %v57_v20  ;;  %v639_v25 = vld [vmem:[%s1279_s2 + $0x70] sm:$0xff]  ;;  %v20_v27 = vld [vmem:[%s1278_s1 + $0x28] sm:$0xff] }
   0xa   :  { %35 = vmatpush.msra.mxu0 %v26_v8  ;;  %78 = vmatpush.msra.mxu1 %v54_v19  ;;  %v623_v26 = vld [vmem:[%s1278_s1 + $0xb0] sm:$0xff]  ;;  %v637_v28 = vld [vmem:[%s1279_s2 + $0x60] sm:$0xff]  ;;  %v622_v29 = vld [vmem:[%s1278_s1 + $0xa8] sm:$0xff] }
   0xb   :  { %138 = vmatpush.msra.mxu3 %v628_v9  ;;  %v19_v30 = vld [vmem:[%s1278_s1 + $0x20] sm:$0xff]  ;;  %v18_v32 = vld [vmem:[%s1278_s1 + $0x18] sm:$0xff]  ;;  %v17_v34 = vld [vmem:[%s1278_s1 + $0x10] sm:$0xff] }
   0xc   :  { %36 = vmatpush.msra.mxu0 %v25_v10  ;;  %79 = vmatpush.msra.mxu1 %v52_v23  ;;  %v621_v31 = vld [vmem:[%s1278_s1 + $0xa0] sm:$0xff]  ;;  %v620_v33 = vld [vmem:[%s1278_s1 + $0x98] sm:$0xff]  ;;  %v619_v35 = vld [vmem:[%s1278_s1 + $0x90] sm:$0xff] }
   0xd   :  { %139 = vmatpush.msra.mxu3 %v627_v11  ;;  %v16_v36 = vld [vmem:[%s1278_s1 + $0x8] sm:$0xff]  ;;  %v15_v38 = vld [vmem:[%s1278_s1] sm:$0xff]  ;;  %v55_v42 = vld [vmem:[%s1279_s2 + $0x18] sm:$0xff] }
   0xe   :  { %37 = vmatpush.msra.mxu0 %v24_v12  ;;  %179 = vmatpush.msrb.mxu1 %v639_v25  ;;  %v618_v37 = vld [vmem:[%s1278_s1 + $0x88] sm:$0xff]  ;;  %v14_v39 = vld [vmem:[%s1280_s0] sm:$0x1]  ;;  %v616_v41 = vld [vmem:[%s1280_s0 + $0x1] sm:$0x1] }
   0xf   :  { %140 = vmatpush.msra.mxu3 %v626_v13  ;;  %v617_v40 = vld [vmem:[%s1278_s1 + $0x80] sm:$0xff]  ;;  %v635_v43 = vld [vmem:[%s1279_s2 + $0x50] sm:$0xff]  ;;  %98 = vmatpush.msra.mxu2 %v55_v42  ;;  %v53_v44 = vld [vmem:[%s1279_s2 + $0x8] sm:$0xff] }
  0x10   :  { %38 = vmatpush.msra.mxu0 %v23_v16  ;;  %180 = vmatpush.msrb.mxu1 %v637_v28  ;;  %v633_v45 = vld [vmem:[%s1279_s2 + $0x40] sm:$0xff]  ;;  %v640_v46 = vld [vmem:[%s1279_s2 + $0x78] sm:$0xff]  ;;  %v638_v47 = vld [vmem:[%s1279_s2 + $0x68] sm:$0xff] }
  0x11   :  { %141 = vmatpush.msra.mxu3 %v625_v18  ;;  %99 = vmatpush.msra.mxu2 %v53_v44  ;;  %v636_v48 = vld [vmem:[%s1279_s2 + $0x58] sm:$0xff]  ;;  %v634_v49 = vld [vmem:[%s1279_s2 + $0x48] sm:$0xff]  ;;  %v687_v52 = vld [vmem:[%s1278_s1 + $0x1f0] sm:$0xff] }
  0x12   :  { %39 = vmatpush.msra.mxu0 %v22_v21  ;;  %181 = vmatpush.msrb.mxu1 %v635_v43  ;;  %v688_v50 = vld [vmem:[%s1278_s1 + $0x1f8] sm:$0xff]  ;;  %v686_v55 = vld [vmem:[%s1278_s1 + $0x1e8] sm:$0xff]  ;;  %v659_v56 = vld [vmem:[%s1278_s1 + $0x170] sm:$0xff] }
  0x13   :  { %142 = vmatpush.msra.mxu3 %v624_v22  ;;  %199 = vmatpush.msrb.mxu2 %v640_v46  ;;  %v660_v54 = vld [vmem:[%s1278_s1 + $0x178] sm:$0xff]  ;;  %v685_v57 = vld [vmem:[%s1278_s1 + $0x1e0] sm:$0xff]  ;;  %v658_v58 = vld [vmem:[%s1278_s1 + $0x168] sm:$0xff] }
  0x14   :  { %40 = vmatpush.msra.mxu0 %v21_v24  ;;  %182 = vmatpush.msrb.mxu1 %v633_v45  ;;  %v684_v59 = vld [vmem:[%s1278_s1 + $0x1d8] sm:$0xff]  ;;  %v657_v60 = vld [vmem:[%s1278_s1 + $0x160] sm:$0xff]  ;;  %v683_v62 = vld [vmem:[%s1278_s1 + $0x1d0] sm:$0xff] }
  0x15   :  { %143 = vmatpush.msra.mxu3 %v623_v26  ;;  %200 = vmatpush.msrb.mxu2 %v638_v47  ;;  %v656_v0 = vld [vmem:[%s1278_s1 + $0x158] sm:$0xff]  ;;  %v682_v1 = vld [vmem:[%s1278_s1 + $0x1c8] sm:$0xff]  ;;  %v655_v2 = vld [vmem:[%s1278_s1 + $0x150] sm:$0xff] }
  0x16   :  { %41 = vmatpush.msra.mxu0 %v20_v27  ;;  %v681_v3 = vld [vmem:[%s1278_s1 + $0x1c0] sm:$0xff]  ;;  %v654_v4 = vld [vmem:[%s1278_s1 + $0x148] sm:$0xff]  ;;  %v680_v5 = vld [vmem:[%s1278_s1 + $0x1b8] sm:$0xff] }
  0x17   :  { %144 = vmatpush.msra.mxu3 %v622_v29  ;;  %201 = vmatpush.msrb.mxu2 %v636_v48  ;;  %v653_v6 = vld [vmem:[%s1278_s1 + $0x140] sm:$0xff]  ;;  %v679_v7 = vld [vmem:[%s1278_s1 + $0x1b0] sm:$0xff]  ;;  %v652_v8 = vld [vmem:[%s1278_s1 + $0x138] sm:$0xff] }
  0x18   :  { %42 = vmatpush.msra.mxu0 %v19_v30  ;;  %v678_v9 = vld [vmem:[%s1278_s1 + $0x1a8] sm:$0xff]  ;;  %v651_v10 = vld [vmem:[%s1278_s1 + $0x130] sm:$0xff]  ;;  %v677_v11 = vld [vmem:[%s1278_s1 + $0x1a0] sm:$0xff] }
  0x19   :  { %145 = vmatpush.msra.mxu3 %v621_v31  ;;  %202 = vmatpush.msrb.mxu2 %v634_v49  ;;  %v650_v12 = vld [vmem:[%s1278_s1 + $0x128] sm:$0xff]  ;;  %v676_v13 = vld [vmem:[%s1278_s1 + $0x198] sm:$0xff]  ;;  %v649_v14 = vld [vmem:[%s1278_s1 + $0x120] sm:$0xff] }
  0x1a   :  { %43 = vmatpush.msra.mxu0 %v18_v32  ;;  %v675_v15 = vld [vmem:[%s1278_s1 + $0x190] sm:$0xff]  ;;  %v648_v16 = vld [vmem:[%s1278_s1 + $0x118] sm:$0xff]  ;;  %v674_v17 = vld [vmem:[%s1278_s1 + $0x188] sm:$0xff]  ;;  %v110_v32 = vlaneseq }
  0x1b   :  { %146 = vmatpush.msra.mxu3 %v620_v33  ;;  %v647_v18 = vld [vmem:[%s1278_s1 + $0x110] sm:$0xff]  ;;  %v673_v19 = vld [vmem:[%s1278_s1 + $0x180] sm:$0xff]  ;;  %v646_v21 = vld [vmem:[%s1278_s1 + $0x108] sm:$0xff] }
  0x1c   :  { %44 = vmatpush.msra.mxu0 %v17_v34  ;;  %v672_v20 = vld [vmem:[%s1280_s0 + $0x3] sm:$0x1]  ;;  %v644_v23 = vld [vmem:[%s1280_s0 + $0x2] sm:$0x1]  ;;  %v667_v24 = vld [vmem:[%s1279_s2 + $0xb0] sm:$0xff]  ;;  %vm1056_vm2 = vcmp.lt.s32.totalorder %v110_v32, 256 }
  0x1d   :  { %147 = vmatpush.msra.mxu3 %v619_v35  ;;  %v645_v22 = vld [vmem:[%s1278_s1 + $0x100] sm:$0xff]  ;;  %v663_v26 = vld [vmem:[%s1279_s2 + $0x90] sm:$0xff]  ;;  %v668_v28 = vld [vmem:[%s1279_s2 + $0xb8] sm:$0xff] }
  0x1e   :  { %45 = vmatpush.msra.mxu0 %v16_v36  ;;  %v665_v25 = vld [vmem:[%s1279_s2 + $0xa0] sm:$0xff]  ;;  %v666_v29 = vld [vmem:[%s1279_s2 + $0xa8] sm:$0xff]  ;;  %v664_v30 = vld [vmem:[%s1279_s2 + $0x98] sm:$0xff] }
  0x1f   :  { %148 = vmatpush.msra.mxu3 %v618_v37  ;;  %v661_v27 = vld [vmem:[%s1279_s2 + $0x80] sm:$0xff]  ;;  %v662_v31 = vld [vmem:[%s1279_s2 + $0x88] sm:$0xff]  ;;  %v696_v42 = vld [vmem:[%s1279_s2 + $0xf8] sm:$0xff] }
  0x20   :  { %46 = vmatpush.msra.mxu0 %v15_v38  ;;  %v694_v43 = vld [vmem:[%s1279_s2 + $0xe8] sm:$0xff]  ;;  %v692_v45 = vld [vmem:[%s1279_s2 + $0xd8] sm:$0xff] }
  0x21   :  { %47 = vmatmul.f32.vlgmr.msra.gmra.mxu0 %v14_v39  ;;  %149 = vmatpush.msra.mxu3 %v617_v40  ;;  %v690_v48 = vld [vmem:[%s1279_s2 + $0xc8] sm:$0xff]  ;;  %v732_v32 = vld [vmem:[%s1278_s1 + $0x298] sm:$0xff] }
  0x22   :  { %150 = vmatmul.f32.vlgmr.msra.gmra.mxu3 %v616_v41  ;;  %332 = vmatpush.msrb.mxu0 %v688_v50  ;;  %v695_v50 = vld [vmem:[%s1279_s2 + $0xf0] sm:$0xff] }
  0x24   :  { %333 = vmatpush.msrb.mxu0 %v687_v52  ;;  %v691_v52 = vld [vmem:[%s1279_s2 + $0xd0] sm:$0xff] }
  0x26   :  { %334 = vmatpush.msrb.mxu0 %v686_v55  ;;  %v715_v55 = vld [vmem:[%s1278_s1 + $0x270] sm:$0xff] }
  0x28   :  { %335 = vmatpush.msrb.mxu0 %v685_v57  ;;  %v713_v57 = vld [vmem:[%s1278_s1 + $0x260] sm:$0xff] }
  0x2a   :  { %336 = vmatpush.msrb.mxu0 %v684_v59  ;;  %v711_v59 = vld [vmem:[%s1278_s1 + $0x250] sm:$0xff] }
  0x2c   :  { %337 = vmatpush.msrb.mxu0 %v683_v62  ;;  %v708_v62 = vld [vmem:[%s1278_s1 + $0x238] sm:$0xff] }
  0x2e   :  { %338 = vmatpush.msrb.mxu0 %v682_v1  ;;  %v705_v1 = vld [vmem:[%s1278_s1 + $0x220] sm:$0xff] }
  0x30   :  { %339 = vmatpush.msrb.mxu0 %v681_v3  ;;  %v703_v3 = vld [vmem:[%s1278_s1 + $0x210] sm:$0xff] }
  0x32   :  { %340 = vmatpush.msrb.mxu0 %v680_v5  ;;  %v701_v5 = vld [vmem:[%s1278_s1 + $0x200] sm:$0xff] }
  0x34   :  { %341 = vmatpush.msrb.mxu0 %v679_v7  ;;  %v723_v7 = vld [vmem:[%s1279_s2 + $0x130] sm:$0xff] }
  0x35   :  { %476 = vmatpush.msrb.mxu3 %v723_v7 }
  0x36   :  { %342 = vmatpush.msrb.mxu0 %v678_v9  ;;  %v719_v9 = vld [vmem:[%s1279_s2 + $0x110] sm:$0xff] }
  0x38   :  { %343 = vmatpush.msrb.mxu0 %v677_v11  ;;  %v744_v11 = vld [vmem:[%s1278_s1 + $0x2f8] sm:$0xff] }
  0x3a   :  { %344 = vmatpush.msrb.mxu0 %v676_v13  ;;  %v724_v13 = vld [vmem:[%s1279_s2 + $0x138] sm:$0xff] }
  0x3c   :  { %345 = vmatpush.msrb.mxu0 %v675_v15  ;;  %v742_v15 = vld [vmem:[%s1278_s1 + $0x2e8] sm:$0xff] }
  0x3e   :  { %346 = vmatpush.msrb.mxu0 %v674_v17  ;;  %v740_v17 = vld [vmem:[%s1278_s1 + $0x2d8] sm:$0xff] }
  0x40   :  { %347 = vmatpush.msrb.mxu0 %v673_v19  ;;  %v738_v19 = vld [vmem:[%s1278_s1 + $0x2c8] sm:$0xff] }
  0x41   :  { %348 = vmatmul.f32.vlgmr.msrb.gmra.mxu0 %v672_v20  ;;  %v737_v20 = vld [vmem:[%s1278_s1 + $0x2c0] sm:$0xff] }
  0x9e   :  { %v48_v51 = vpop.f32.mrf.mxu0 }
  0x9f   :  { %v51_v53 = vmax.f32 %v48_v51, 0.0  ;;  %v693_v51 = vld [vmem:[%s1279_s2 + $0xe0] sm:$0xff] }
  0xa1   :  { %614 = vmatmul.msk.f32.vlgmr.msra.gmra.mxu1 %vm60_vm0, %v51_v53  ;;  %615 = vmatmul.msk.f32.vlgmr.msra.gmra.mxu2 %vm60_vm0, %v51_v53  ;;  %v689_v53 = vld [vmem:[%s1279_s2 + $0xc0] sm:$0xff] }
  0xa2   :  { %233 = vmatpush.msra.mxu1 %v660_v54  ;;  %278 = vmatpush.msra.mxu2 %v667_v24  ;;  %v716_v54 = vld [vmem:[%s1278_s1 + $0x278] sm:$0xff] }
  0xa3   :  { %v720_v24 = vld [vmem:[%s1279_s2 + $0x118] sm:$0xff] }
  0xa4   :  { %234 = vmatpush.msra.mxu1 %v659_v56  ;;  %279 = vmatpush.msra.mxu2 %v665_v25  ;;  %v714_v56 = vld [vmem:[%s1278_s1 + $0x268] sm:$0xff] }
  0xa5   :  { %v151_v61 = vpop.f32.mrf.mxu3  ;;  %v734_v25 = vld [vmem:[%s1278_s1 + $0x2a8] sm:$0xff] }
  0xa6   :  { %235 = vmatpush.msra.mxu1 %v658_v58  ;;  %v154_v63 = vmax.f32 %v151_v61, 0.0  ;;  %280 = vmatpush.msra.mxu2 %v663_v26  ;;  %v712_v58 = vld [vmem:[%s1278_s1 + $0x258] sm:$0xff]  ;;  %v709_v61 = vld [vmem:[%s1278_s1 + $0x240] sm:$0xff] }
  0xa8   :  { %236 = vmatpush.msra.mxu1 %v657_v60  ;;  %281 = vmatpush.msra.mxu2 %v661_v27  ;;  %v710_v60 = vld [vmem:[%s1278_s1 + $0x248] sm:$0xff] }
  0xa9   :  { %642 = vmatmul.msk.f32.vlgmr.msrb.gmra.mxu2 %vm60_vm0, %v154_v63  ;;  %641 = vmatmul.msk.f32.vlgmr.msrb.gmra.mxu1 %vm60_vm0, %v154_v63  ;;  %v707_v63 = vld [vmem:[%s1278_s1 + $0x230] sm:$0xff] }
  0xaa   :  { %237 = vmatpush.msra.mxu1 %v656_v0  ;;  %298 = vmatpush.msrb.mxu2 %v668_v28  ;;  %v706_v0 = vld [vmem:[%s1278_s1 + $0x228] sm:$0xff] }
  0xab   :  { %v718_v28 = vld [vmem:[%s1279_s2 + $0x108] sm:$0xff] }
  0xac   :  { %238 = vmatpush.msra.mxu1 %v655_v2  ;;  %299 = vmatpush.msrb.mxu2 %v666_v29  ;;  %v704_v2 = vld [vmem:[%s1278_s1 + $0x218] sm:$0xff]  ;;  %v733_v29 = vld [vmem:[%s1278_s1 + $0x2a0] sm:$0xff] }
  0xae   :  { %239 = vmatpush.msra.mxu1 %v654_v4  ;;  %300 = vmatpush.msrb.mxu2 %v664_v30  ;;  %v702_v4 = vld [vmem:[%s1278_s1 + $0x208] sm:$0xff] }
  0xb0   :  { %240 = vmatpush.msra.mxu1 %v653_v6  ;;  %301 = vmatpush.msrb.mxu2 %v662_v31  ;;  %v700_v6 = vld [vmem:[%s1280_s0 + $0x4] sm:$0x1] }
  0xb2   :  { %241 = vmatpush.msra.mxu1 %v652_v8  ;;  %v721_v8 = vld [vmem:[%s1279_s2 + $0x120] sm:$0xff] }
  0xb3   :  { %477 = vmatpush.msrb.mxu3 %v721_v8 }
  0xb4   :  { %242 = vmatpush.msra.mxu1 %v651_v10  ;;  %v717_v10 = vld [vmem:[%s1279_s2 + $0x100] sm:$0xff] }
  0xb5   :  { %478 = vmatpush.msrb.mxu3 %v719_v9 }
  0xb6   :  { %243 = vmatpush.msra.mxu1 %v650_v12  ;;  %v743_v12 = vld [vmem:[%s1278_s1 + $0x2f0] sm:$0xff] }
  0xb7   :  { %479 = vmatpush.msrb.mxu3 %v717_v10 }
  0xb8   :  { %244 = vmatpush.msra.mxu1 %v649_v14  ;;  %v722_v14 = vld [vmem:[%s1279_s2 + $0x128] sm:$0xff] }
  0xb9   :  { %530 = vmatpush.msra.mxu3 %v744_v11 }
  0xba   :  { %245 = vmatpush.msra.mxu1 %v648_v16  ;;  %v741_v16 = vld [vmem:[%s1278_s1 + $0x2e0] sm:$0xff] }
  0xbb   :  { %531 = vmatpush.msra.mxu3 %v743_v12 }
  0xbc   :  { %246 = vmatpush.msra.mxu1 %v647_v18  ;;  %v739_v18 = vld [vmem:[%s1278_s1 + $0x2d0] sm:$0xff] }
  0xbd   :  { %532 = vmatpush.msra.mxu3 %v742_v15 }
  0xbe   :  { %247 = vmatpush.msra.mxu1 %v646_v21  ;;  %v349_v44 = vpop.f32.mrf.mxu0 }
  0xbf   :  { %v352_v47 = vmax.f32 %v349_v44, 0.0  ;;  %533 = vmatpush.msra.mxu3 %v741_v16  ;;  %v751_v44 = vld [vmem:[%s1279_s2 + $0x170] sm:$0xff] }
  0xc0   :  { %248 = vmatpush.msra.mxu1 %v645_v22  ;;  %v736_v22 = vld [vmem:[%s1278_s1 + $0x2b8] sm:$0xff] }
  0xc1   :  { %249 = vmatmul.f32.vlgmr.msra.gmra.mxu1 %v644_v23  ;;  %534 = vmatpush.msra.mxu3 %v740_v17  ;;  %v735_v23 = vld [vmem:[%s1278_s1 + $0x2b0] sm:$0xff] }
  0xc2   :  { %397 = vmatpush.msrb.mxu1 %v696_v42  ;;  %v728_v42 = vld [vmem:[%s1280_s0 + $0x5] sm:$0x1] }
  0xc3   :  { %535 = vmatpush.msra.mxu3 %v739_v18 }
  0xc4   :  { %398 = vmatpush.msrb.mxu1 %v694_v43  ;;  %v752_v43 = vld [vmem:[%s1279_s2 + $0x178] sm:$0xff] }
  0xc5   :  { %536 = vmatpush.msra.mxu3 %v738_v19  ;;  %595 = vmatpush.msra.mxu0 %v752_v43 }
  0xc6   :  { %399 = vmatpush.msrb.mxu1 %v692_v45  ;;  %v750_v45 = vld [vmem:[%s1279_s2 + $0x168] sm:$0xff] }
  0xc7   :  { %537 = vmatpush.msra.mxu3 %v737_v20  ;;  %596 = vmatpush.msra.mxu0 %v750_v45 }
  0xc8   :  { %400 = vmatpush.msrb.mxu1 %v690_v48  ;;  %v747_v48 = vld [vmem:[%s1279_s2 + $0x150] sm:$0xff] }
  0xc9   :  { %698 = vmatmul.msk.f32.vlgmr.msrb.gmra.mxu1 %vm60_vm0, %v352_v47  ;;  %538 = vmatpush.msra.mxu3 %v736_v22 }
  0xca   :  { %496 = vmatpush.msra.mxu1 %v724_v13 }
  0xcb   :  { %539 = vmatpush.msra.mxu3 %v735_v23 }
  0xcc   :  { %497 = vmatpush.msra.mxu1 %v722_v14 }
  0xcd   :  { %540 = vmatpush.msra.mxu3 %v734_v25 }
  0xce   :  { %498 = vmatpush.msra.mxu1 %v720_v24 }
  0xcf   :  { %541 = vmatpush.msra.mxu3 %v733_v29 }
  0xd0   :  { %499 = vmatpush.msra.mxu1 %v718_v28 }
  0xd1   :  { %542 = vmatpush.msra.mxu3 %v732_v32 }
  0xd2   :  { %575 = vmatpush.msrb.mxu1 %v751_v44 }
 0x11e   :  { %v81_v33 = vpop.f32.mrf.mxu1 }
 0x124   :  { %v101_v34 = vpop.f32.mrf.mxu2 }
 0x125   :  { %v106_v35 = vrot.slane %v101_v34, 7 }
 0x126   :  { %v184_v39 = vpop.f32.mrf.mxu1 }
 0x127   :  { %v108_v37 = vsel %vm107_vm1, %v81_v33, %v106_v35  ;;  %v731_v33 = vld [vmem:[%s1278_s1 + $0x290] sm:$0xff]  ;;  %v730_v35 = vld [vmem:[%s1278_s1 + $0x288] sm:$0xff] }
 0x128   :  { %114 = vst.msk [vmem:[%s1281_s3] sm:$0x3] %vm1056_vm2, %v108_v37  ;;  %543 = vmatpush.msra.mxu3 %v731_v33  ;;  %v729_v37 = vld [vmem:[%s1278_s1 + $0x280] sm:$0xff] }
 0x12a   :  { %544 = vmatpush.msra.mxu3 %v730_v35 }
 0x12c   :  { %v204_v38 = vpop.f32.mrf.mxu2  ;;  %545 = vmatpush.msra.mxu3 %v729_v37 }
 0x12d   :  { %v209_v40 = vrot.slane %v204_v38, 7 }
 0x12f   :  { %v210_v41 = vsel %vm107_vm1, %v184_v39, %v209_v40 }
 0x130   :  { %643 = vst.msk [vmem:[%s1281_s3 + $0x2] sm:$0x3] %vm1056_vm2, %v210_v41 }
 0x13e   :  { %v250_v46 = vpop.f32.mrf.mxu1 }
 0x13f   :  { %v253_v49 = vmax.f32 %v250_v46, 0.0  ;;  %v749_v46 = vld [vmem:[%s1279_s2 + $0x160] sm:$0xff] }
 0x140   :  { %576 = vmatpush.msrb.mxu1 %v749_v46 }
 0x141   :  { %669 = vmatmul.msk.f32.vlgmr.msra.gmra.mxu2 %vm60_vm0, %v253_v49 }
 0x142   :  { %377 = vmatpush.msra.mxu2 %v695_v50  ;;  %577 = vmatpush.msrb.mxu1 %v747_v48  ;;  %v745_v50 = vld [vmem:[%s1279_s2 + $0x140] sm:$0xff] }
 0x144   :  { %378 = vmatpush.msra.mxu2 %v693_v51  ;;  %578 = vmatpush.msrb.mxu1 %v745_v50 }
 0x146   :  { %379 = vmatpush.msra.mxu2 %v691_v52  ;;  %v402_v30 = vpop.f32.mrf.mxu1 }
 0x147   :  { %v407_v34 = vrot.slane %v402_v30, 7 }
 0x148   :  { %380 = vmatpush.msra.mxu2 %v689_v53 }
 0x149   :  { %670 = vmatmul.msk.f32.vlgmr.msrb.gmra.mxu2 %vm60_vm0, %v253_v49  ;;  %v746_v49 = vld [vmem:[%s1279_s2 + $0x148] sm:$0xff] }
 0x14a   :  { %431 = vmatpush.msrb.mxu2 %v716_v54 }
 0x14c   :  { %432 = vmatpush.msrb.mxu2 %v715_v55 }
 0x14e   :  { %433 = vmatpush.msrb.mxu2 %v714_v56 }
 0x150   :  { %434 = vmatpush.msrb.mxu2 %v713_v57 }
 0x151   :  { %697 = vmatmul.msk.f32.vlgmr.msra.gmra.mxu2 %vm60_vm0, %v352_v47  ;;  %v748_v47 = vld [vmem:[%s1279_s2 + $0x158] sm:$0xff] }
 0x152   :  { %435 = vmatpush.msrb.mxu2 %v712_v58  ;;  %597 = vmatpush.msra.mxu0 %v748_v47 }
 0x154   :  { %436 = vmatpush.msrb.mxu2 %v711_v59  ;;  %598 = vmatpush.msra.mxu0 %v746_v49 }
 0x156   :  { %437 = vmatpush.msrb.mxu2 %v710_v60 }
 0x158   :  { %438 = vmatpush.msrb.mxu2 %v709_v61 }
 0x15a   :  { %439 = vmatpush.msrb.mxu2 %v708_v62 }
 0x15c   :  { %440 = vmatpush.msrb.mxu2 %v707_v63 }
 0x15e   :  { %441 = vmatpush.msrb.mxu2 %v706_v0 }
 0x160   :  { %442 = vmatpush.msrb.mxu2 %v705_v1 }
 0x162   :  { %443 = vmatpush.msrb.mxu2 %v704_v2 }
 0x164   :  { %444 = vmatpush.msrb.mxu2 %v703_v3 }
 0x166   :  { %445 = vmatpush.msrb.mxu2 %v702_v4 }
 0x168   :  { %446 = vmatpush.msrb.mxu2 %v701_v5 }
 0x169   :  { %447 = vmatmul.f32.vlgmr.msrb.gmra.mxu2 %v700_v6 }
 0x1c4   :  { %v283_v21 = vpop.f32.mrf.mxu2 }
 0x1cc   :  { %v303_v26 = vpop.f32.mrf.mxu2 }
 0x1cd   :  { %v308_v27 = vrot.slane %v303_v26, 7 }
 0x1cf   :  { %v309_v31 = vsel %vm107_vm1, %v283_v21, %v308_v27 }
 0x1d0   :  { %671 = vst.msk [vmem:[%s1281_s3 + $0x4] sm:$0x3] %vm1056_vm2, %v309_v31 }
 0x1d4   :  { %v382_v38 = vpop.f32.mrf.mxu2 }
 0x1d5   :  { %v408_v39 = vsel %vm107_vm1, %v382_v38, %v407_v34 }
 0x1d6   :  { %699 = vst.msk [vmem:[%s1281_s3 + $0x6] sm:$0x3] %vm1056_vm2, %v408_v39 }
 0x1ec   :  { %v448_v40 = vpop.f32.mrf.mxu2 }
 0x1ed   :  { %v451_v41 = vmax.f32 %v448_v40, 0.0 }
 0x1ef   :  { %725 = vmatmul.msk.f32.vlgmr.msrb.gmra.mxu3 %vm60_vm0, %v451_v41  ;;  %726 = vmatmul.msk.f32.vlgmr.msra.gmra.mxu1 %vm60_vm0, %v451_v41 }
 0x1f7   :  { %546 = vmatmul.f32.vlgmr.msra.gmra.mxu3 %v728_v42 }
 0x26c   :  { %v501_v51 = vpop.f32.mrf.mxu1 }
 0x26d   :  { %v506_v52 = vrot.slane %v501_v51, 7 }
 0x272   :  { %v481_v53 = vpop.f32.mrf.mxu3 }
 0x273   :  { %v507_v54 = vsel %vm107_vm1, %v481_v53, %v506_v52 }
 0x274   :  { %727 = vst.msk [vmem:[%s1281_s3 + $0x8] sm:$0x3] %vm1056_vm2, %v507_v54 }
 0x27a   :  { %v547_v55 = vpop.f32.mrf.mxu3 }
 0x27b   :  { %v550_v56 = vmax.f32 %v547_v55, 0.0 }
 0x27d   :  { %753 = vmatmul.msk.f32.vlgmr.msrb.gmra.mxu1 %vm60_vm0, %v550_v56  ;;  %754 = vmatmul.msk.f32.vlgmr.msra.gmra.mxu0 %vm60_vm0, %v550_v56 }
 0x2fa   :  { %v600_v57 = vpop.f32.mrf.mxu0  ;;  %v580_v59 = vpop.f32.mrf.mxu1 }
 0x2fb   :  { %v605_v58 = vrot.slane %v600_v57, 7 }
 0x2fd   :  { %v606_v60 = vsel %vm107_vm1, %v580_v59, %v605_v58 }
 0x2fe   :  { %755 = vst.msk [vmem:[%s1281_s3 + $0xa] sm:$0x3] %vm1056_vm2, %v606_v60 }

</bundles_post_ra>
